<compile_context>
chip_gen: v5e
topology: v5e:2x2
jax: 0.10.0
libtpu: 0.0.40
codegen_flags: <defaults>
</compile_context>

<pallas_src>
import functools

import jax
import jax.numpy as jnp
from jax.experimental import pallas as pl
from jax.experimental.pallas import tpu as pltpu


# ---------------------------------------------------------------------------
# Pallas kernel: fused (3x3 conv + merged 1x1 conv + folded BN) -> bias -> SiLU
# ---------------------------------------------------------------------------
def _repconv_kernel(xp_ref, w_ref, b_ref, o_ref):
    # xp_ref: (1, Cin, H+2, W+2)  halo-padded image for batch n (bf16)
    # w_ref : (9, TCout, Cin)     fused re-parameterized weight, tap-major (bf16)
    # b_ref : (TCout, 1)          fused bias (f32)
    # o_ref : (1, TCout, H*W)     lane-dense output block (bf16)
    cin = xp_ref.shape[1]
    h = xp_ref.shape[2] - 2
    w = xp_ref.shape[3] - 2
    tcout = o_ref.shape[1]
    lanes = o_ref.shape[2]  # == H * W

    # Keep the activation in bf16 end-to-end; only the accumulator is f32.
    x = xp_ref[0]  # (Cin, H+2, W+2) bf16

    # 9 per-tap accumulating matmuls: the patch matrix never exists as one
    # object in VMEM (no concat), each slab is a single (Cin, H*W) bf16 window.
    acc = jnp.zeros((tcout, lanes), jnp.float32)
    for dy in range(3):
        for dx in range(3):
            slab = x[:, dy:dy + h, dx:dx + w].reshape(cin, lanes)  # bf16
            acc = acc + jnp.dot(w_ref[3 * dy + dx], slab,
                                preferred_element_type=jnp.float32)

    # Folded-BN bias (both branches) + SiLU, in f32; cast only at the store.
    y = acc + b_ref[...]
    o_ref[0] = (y * jax.nn.sigmoid(y)).astype(o_ref.dtype)


# ---------------------------------------------------------------------------
# Cout tiling: cap the per-step weight / output / accumulator blocks so they
# double-buffer comfortably inside v7x's 64 MiB VMEM, while keeping the MXU
# M-dimension >= 128 on v5e/v6e.  Small Cout (the demo) stays untiled.
# ---------------------------------------------------------------------------
def _choose_cout_tile(cout):
    if cout % 256 == 0:
        return 256
    if cout % 128 == 0:
        return 128
    return cout


# ---------------------------------------------------------------------------
# Wrapper: layout glue + pallas_call
# ---------------------------------------------------------------------------
@functools.partial(jax.jit, static_argnames=("out_dtype",))
def repconv_forward(x_nchw, w9, bias, *, out_dtype=jnp.bfloat16):
    """Fused RepConv forward.

    x_nchw: (N, Cin, H, W) f32 activations.
    w9:     (9, Cout, Cin) bf16 fused weight (tap-major, tap = 3*dy + dx).
    bias:   (Cout, 1) f32 fused bias.
    Returns (N, Cout, H, W) in `out_dtype` (bf16 by default).
    """
    N, Cin, H, W = x_nchw.shape
    Cout = w9.shape[1]
    assert w9.shape == (9, Cout, Cin)
    lanes = H * W  # lane-dense output last dim (multiple of 128 for typical
                   # YOLO spatial sizes; full-extent blocks stay legal otherwise)

    tco = _choose_cout_tile(Cout)
    n_co = Cout // tco

    # "same" padding once, in bf16 (cast BEFORE pad -> half the staged bytes).
    # No per-tile halo duplication: every kernel block below is non-overlapping.
    xp = jnp.pad(x_nchw.astype(jnp.bfloat16), ((0, 0), (0, 0), (1, 1), (1, 1)))

    out_flat = pl.pallas_call(
        _repconv_kernel,
        out_shape=jax.ShapeDtypeStruct((N, Cout, lanes), out_dtype),
        grid_spec=pltpu.PrefetchScalarGridSpec(
            num_scalar_prefetch=0,
            grid=(N, n_co),
            in_specs=[
                # Full padded image for batch n; invariant along the Cout axis,
                # so it is fetched once per n and stays resident across co.
                pl.BlockSpec((1, Cin, H + 2, W + 2), lambda n, c: (n, 0, 0, 0)),
                # Fused weight slab for this Cout tile.
                pl.BlockSpec((9, tco, Cin), lambda n, c: (0, c, 0)),
                # Fused bias slab.
                pl.BlockSpec((tco, 1), lambda n, c: (c, 0)),
            ],
            # Lane-dense bf16 output: last dim is H*W, so (N, Cout, H*W)
            # reshapes to NCHW for free.
            out_specs=pl.BlockSpec((1, tco, lanes), lambda n, c: (n, c, 0)),
        ),
        compiler_params=pltpu.CompilerParams(
            dimension_semantics=("parallel", "parallel"),
            # vmem_limit_bytes left at default: per-step working set at these
            # shapes is well under the scoped default on all generations.
            # Raise it (and/or shrink tco) for very large Cin * H * W.
        ),
    )(xp, w9, bias)

    return out_flat.reshape(N, Cout, H, W)


# ---------------------------------------------------------------------------
# Deterministic parameters + RepConv re-parameterization (BN folding)
# ---------------------------------------------------------------------------
def make_repconv_params(key, cin, cout):
    ks = jax.random.split(key, 10)
    w3 = jax.random.normal(ks[0], (cout, cin, 3, 3), jnp.float32) * 0.1
    w1 = jax.random.normal(ks[1], (cout, cin, 1, 1), jnp.float32) * 0.1

    def bn(k4):
        g = jax.random.uniform(k4[0], (cout,), minval=0.5, maxval=1.5)
        b = jax.random.normal(k4[1], (cout,), jnp.float32) * 0.1
        m = jax.random.normal(k4[2], (cout,), jnp.float32) * 0.1
        v = 1.0 + jax.random.uniform(k4[3], (cout,), minval=0.0, maxval=0.2)
        return g, b, m, v

    return w3, w1, bn(ks[2:6]), bn(ks[6:10])


def fold_repconv(w3, w1, bn1, bn2, eps=1e-3):
    """Fold BN1/BN2 and merge the 1x1 branch into the 3x3 centre tap."""
    def fold(g, b, m, v):
        s = g / jnp.sqrt(v + eps)
        return s, b - m * s

    s1, b1 = fold(*bn1)
    s2, b2 = fold(*bn2)
    wf = w3 * s1[:, None, None, None]
    wf = wf.at[:, :, 1, 1].add(w1[:, :, 0, 0] * s2[:, None])
    bias = (b1 + b2).reshape(-1, 1).astype(jnp.float32)          # (Cout, 1)
    cout, cin = wf.shape[0], wf.shape[1]
    # (Cout, Cin, 3, 3) -> (dy, dx, Cout, Cin) -> (9, Cout, Cin): tap-major,
    # matching the kernel's per-tap matmul order (tap = 3*dy + dx).
    w9 = jnp.transpose(wf, (2, 3, 0, 1)).reshape(9, cout, cin)
    return w9.astype(jnp.bfloat16), bias


# ---------------------------------------------------------------------------
# Pure-JAX reference (eval-mode BN semantics) for a correctness check
# ---------------------------------------------------------------------------
def repconv_reference(x, w3, w1, bn1, bn2, eps=1e-3):
    conv = functools.partial(
        jax.lax.conv_general_dilated,
        window_strides=(1, 1),
        dimension_numbers=("NCHW", "OIHW", "NCHW"),
        precision=jax.lax.Precision.HIGHEST,
    )
    y1 = conv(x, w3, padding=((1, 1), (1, 1)))
    y2 = conv(x, w1, padding=((0, 0), (0, 0)))

    def bn(y, p):
        g, b, m, v = p
        c = lambda a: a[None, :, None, None]
        return (y - c(m)) / jnp.sqrt(c(v) + eps) * c(g) + c(b)

    z = bn(y1, bn1) + bn(y2, bn2)
    return z * jax.nn.sigmoid(z)


if __name__ == "__main__":
    key = jax.random.PRNGKey(0)
    kx, kp = jax.random.split(key)

    # RepConv(in_channels=4, out_channels=8), input (N=2, C=4, H=16, W=16).
    N, Cin, H, W = 2, 4, 16, 16
    Cout = 8

    x = jax.random.normal(kx, (N, Cin, H, W), jnp.float32)
    w3, w1, bn1, bn2 = make_repconv_params(kp, Cin, Cout)
    w9, bias = fold_repconv(w3, w1, bn1, bn2)

    y = repconv_forward(x, w9, bias)
    jax.block_until_ready(y)

    assert y.shape == (N, Cout, H, W), y.shape
    y_f32 = y.astype(jnp.float32)
    assert jnp.all(jnp.isfinite(y_f32))

    # Kernel uses bf16 activations/weights/output vs. an f32 reference, so the
    # tolerance reflects bf16 quantization (values are O(1)).
    ref = repconv_reference(x, w3, w1, bn1, bn2)
    max_err = float(jnp.max(jnp.abs(y_f32 - ref)))
    assert max_err < 1e-1, f"max abs error {max_err}"

    print("KERNEL_OK")
</pallas_src>

<mosaic_0001>
module attributes {stable_mosaic.version = 11 : i64} {
  func.func @_repconv_kernel(%arg0: i32, %arg1: i32, %arg2: memref<1x4x18x18xbf16, #tpu.memory_space<vmem>>, %arg3: memref<9x8x4xbf16, #tpu.memory_space<vmem>>, %arg4: memref<8x1xf32, #tpu.memory_space<vmem>>, %arg5: memref<1x8x256xbf16, #tpu.memory_space<vmem>>) attributes {dimension_semantics = [#tpu.dimension_semantics<parallel>, #tpu.dimension_semantics<parallel>], iteration_bounds = array<i64: 2, 1>, scalar_prefetch = 0 : i64, scratch_operands = 0 : i64, tpu.core_type = #tpu.core_type<tc>, window_params = [{transform_indices = @transform_0, window_bounds = array<i64: 1, 4, 18, 18>}, {transform_indices = @transform_1, window_bounds = array<i64: 9, 8, 4>}, {transform_indices = @transform_2, window_bounds = array<i64: 8, 1>}, {transform_indices = @transform_3, window_bounds = array<i64: 1, 8, 256>}]} {
    %c0 = arith.constant 0 : index
    %c0_0 = arith.constant 0 : index
    %c0_1 = arith.constant 0 : index
    %c0_2 = arith.constant 0 : index
    %0 = vector.load %arg2[%c0, %c0_0, %c0_1, %c0_2] : memref<1x4x18x18xbf16, #tpu.memory_space<vmem>>, vector<1x4x18x18xbf16>
    %1 = vector.shape_cast %0 : vector<1x4x18x18xbf16> to vector<4x18x18xbf16>
    %cst = arith.constant 0.000000e+00 : f32
    %2 = vector.broadcast %cst : f32 to vector<8x256xf32>
    %3 = vector.extract_strided_slice %1 {offsets = [0, 0, 0], sizes = [4, 16, 16], strides = [1, 1, 1]} : vector<4x18x18xbf16> to vector<4x16x16xbf16>
    %4 = vector.shape_cast %3 : vector<4x16x16xbf16> to vector<4x256xbf16>
    %c0_3 = arith.constant 0 : index
    %c0_4 = arith.constant 0 : index
    %c0_5 = arith.constant 0 : index
    %5 = vector.load %arg3[%c0_3, %c0_4, %c0_5] : memref<9x8x4xbf16, #tpu.memory_space<vmem>>, vector<1x8x4xbf16>
    %6 = vector.shape_cast %5 : vector<1x8x4xbf16> to vector<8x4xbf16>
    %cst_6 = arith.constant dense<0.000000e+00> : vector<8x256xf32>
    %7 = tpu.matmul %6, %4, %cst_6 {dimension_numbers = #tpu.dot_dimension_numbers<[1], [0], [0], [1], [0, 0, 1, 1], [], []>} : vector<8x4xbf16>, vector<4x256xbf16>, vector<8x256xf32> -> vector<8x256xf32>
    %8 = arith.addf %2, %7 : vector<8x256xf32>
    %9 = vector.extract_strided_slice %1 {offsets = [0, 0, 1], sizes = [4, 16, 16], strides = [1, 1, 1]} : vector<4x18x18xbf16> to vector<4x16x16xbf16>
    %10 = vector.shape_cast %9 : vector<4x16x16xbf16> to vector<4x256xbf16>
    %c1 = arith.constant 1 : index
    %c0_7 = arith.constant 0 : index
    %c0_8 = arith.constant 0 : index
    %11 = vector.load %arg3[%c1, %c0_7, %c0_8] : memref<9x8x4xbf16, #tpu.memory_space<vmem>>, vector<1x8x4xbf16>
    %12 = vector.shape_cast %11 : vector<1x8x4xbf16> to vector<8x4xbf16>
    %cst_9 = arith.constant dense<0.000000e+00> : vector<8x256xf32>
    %13 = tpu.matmul %12, %10, %cst_9 {dimension_numbers = #tpu.dot_dimension_numbers<[1], [0], [0], [1], [0, 0, 1, 1], [], []>} : vector<8x4xbf16>, vector<4x256xbf16>, vector<8x256xf32> -> vector<8x256xf32>
    %14 = arith.addf %8, %13 : vector<8x256xf32>
    %15 = vector.extract_strided_slice %1 {offsets = [0, 0, 2], sizes = [4, 16, 16], strides = [1, 1, 1]} : vector<4x18x18xbf16> to vector<4x16x16xbf16>
    %16 = vector.shape_cast %15 : vector<4x16x16xbf16> to vector<4x256xbf16>
    %c2 = arith.constant 2 : index
    %c0_10 = arith.constant 0 : index
    %c0_11 = arith.constant 0 : index
    %17 = vector.load %arg3[%c2, %c0_10, %c0_11] : memref<9x8x4xbf16, #tpu.memory_space<vmem>>, vector<1x8x4xbf16>
    %18 = vector.shape_cast %17 : vector<1x8x4xbf16> to vector<8x4xbf16>
    %cst_12 = arith.constant dense<0.000000e+00> : vector<8x256xf32>
    %19 = tpu.matmul %18, %16, %cst_12 {dimension_numbers = #tpu.dot_dimension_numbers<[1], [0], [0], [1], [0, 0, 1, 1], [], []>} : vector<8x4xbf16>, vector<4x256xbf16>, vector<8x256xf32> -> vector<8x256xf32>
    %20 = arith.addf %14, %19 : vector<8x256xf32>
    %21 = vector.extract_strided_slice %1 {offsets = [0, 1, 0], sizes = [4, 16, 16], strides = [1, 1, 1]} : vector<4x18x18xbf16> to vector<4x16x16xbf16>
    %22 = vector.shape_cast %21 : vector<4x16x16xbf16> to vector<4x256xbf16>
    %c3 = arith.constant 3 : index
    %c0_13 = arith.constant 0 : index
    %c0_14 = arith.constant 0 : index
    %23 = vector.load %arg3[%c3, %c0_13, %c0_14] : memref<9x8x4xbf16, #tpu.memory_space<vmem>>, vector<1x8x4xbf16>
    %24 = vector.shape_cast %23 : vector<1x8x4xbf16> to vector<8x4xbf16>
    %cst_15 = arith.constant dense<0.000000e+00> : vector<8x256xf32>
    %25 = tpu.matmul %24, %22, %cst_15 {dimension_numbers = #tpu.dot_dimension_numbers<[1], [0], [0], [1], [0, 0, 1, 1], [], []>} : vector<8x4xbf16>, vector<4x256xbf16>, vector<8x256xf32> -> vector<8x256xf32>
    %26 = arith.addf %20, %25 : vector<8x256xf32>
    %27 = vector.extract_strided_slice %1 {offsets = [0, 1, 1], sizes = [4, 16, 16], strides = [1, 1, 1]} : vector<4x18x18xbf16> to vector<4x16x16xbf16>
    %28 = vector.shape_cast %27 : vector<4x16x16xbf16> to vector<4x256xbf16>
    %c4 = arith.constant 4 : index
    %c0_16 = arith.constant 0 : index
    %c0_17 = arith.constant 0 : index
    %29 = vector.load %arg3[%c4, %c0_16, %c0_17] : memref<9x8x4xbf16, #tpu.memory_space<vmem>>, vector<1x8x4xbf16>
    %30 = vector.shape_cast %29 : vector<1x8x4xbf16> to vector<8x4xbf16>
    %cst_18 = arith.constant dense<0.000000e+00> : vector<8x256xf32>
    %31 = tpu.matmul %30, %28, %cst_18 {dimension_numbers = #tpu.dot_dimension_numbers<[1], [0], [0], [1], [0, 0, 1, 1], [], []>} : vector<8x4xbf16>, vector<4x256xbf16>, vector<8x256xf32> -> vector<8x256xf32>
    %32 = arith.addf %26, %31 : vector<8x256xf32>
    %33 = vector.extract_strided_slice %1 {offsets = [0, 1, 2], sizes = [4, 16, 16], strides = [1, 1, 1]} : vector<4x18x18xbf16> to vector<4x16x16xbf16>
    %34 = vector.shape_cast %33 : vector<4x16x16xbf16> to vector<4x256xbf16>
    %c5 = arith.constant 5 : index
    %c0_19 = arith.constant 0 : index
    %c0_20 = arith.constant 0 : index
    %35 = vector.load %arg3[%c5, %c0_19, %c0_20] : memref<9x8x4xbf16, #tpu.memory_space<vmem>>, vector<1x8x4xbf16>
    %36 = vector.shape_cast %35 : vector<1x8x4xbf16> to vector<8x4xbf16>
    %cst_21 = arith.constant dense<0.000000e+00> : vector<8x256xf32>
    %37 = tpu.matmul %36, %34, %cst_21 {dimension_numbers = #tpu.dot_dimension_numbers<[1], [0], [0], [1], [0, 0, 1, 1], [], []>} : vector<8x4xbf16>, vector<4x256xbf16>, vector<8x256xf32> -> vector<8x256xf32>
    %38 = arith.addf %32, %37 : vector<8x256xf32>
    %39 = vector.extract_strided_slice %1 {offsets = [0, 2, 0], sizes = [4, 16, 16], strides = [1, 1, 1]} : vector<4x18x18xbf16> to vector<4x16x16xbf16>
    %40 = vector.shape_cast %39 : vector<4x16x16xbf16> to vector<4x256xbf16>
    %c6 = arith.constant 6 : index
    %c0_22 = arith.constant 0 : index
    %c0_23 = arith.constant 0 : index
    %41 = vector.load %arg3[%c6, %c0_22, %c0_23] : memref<9x8x4xbf16, #tpu.memory_space<vmem>>, vector<1x8x4xbf16>
    %42 = vector.shape_cast %41 : vector<1x8x4xbf16> to vector<8x4xbf16>
    %cst_24 = arith.constant dense<0.000000e+00> : vector<8x256xf32>
    %43 = tpu.matmul %42, %40, %cst_24 {dimension_numbers = #tpu.dot_dimension_numbers<[1], [0], [0], [1], [0, 0, 1, 1], [], []>} : vector<8x4xbf16>, vector<4x256xbf16>, vector<8x256xf32> -> vector<8x256xf32>
    %44 = arith.addf %38, %43 : vector<8x256xf32>
    %45 = vector.extract_strided_slice %1 {offsets = [0, 2, 1], sizes = [4, 16, 16], strides = [1, 1, 1]} : vector<4x18x18xbf16> to vector<4x16x16xbf16>
    %46 = vector.shape_cast %45 : vector<4x16x16xbf16> to vector<4x256xbf16>
    %c7 = arith.constant 7 : index
    %c0_25 = arith.constant 0 : index
    %c0_26 = arith.constant 0 : index
    %47 = vector.load %arg3[%c7, %c0_25, %c0_26] : memref<9x8x4xbf16, #tpu.memory_space<vmem>>, vector<1x8x4xbf16>
    %48 = vector.shape_cast %47 : vector<1x8x4xbf16> to vector<8x4xbf16>
    %cst_27 = arith.constant dense<0.000000e+00> : vector<8x256xf32>
    %49 = tpu.matmul %48, %46, %cst_27 {dimension_numbers = #tpu.dot_dimension_numbers<[1], [0], [0], [1], [0, 0, 1, 1], [], []>} : vector<8x4xbf16>, vector<4x256xbf16>, vector<8x256xf32> -> vector<8x256xf32>
    %50 = arith.addf %44, %49 : vector<8x256xf32>
    %51 = vector.extract_strided_slice %1 {offsets = [0, 2, 2], sizes = [4, 16, 16], strides = [1, 1, 1]} : vector<4x18x18xbf16> to vector<4x16x16xbf16>
    %52 = vector.shape_cast %51 : vector<4x16x16xbf16> to vector<4x256xbf16>
    %c8 = arith.constant 8 : index
    %c0_28 = arith.constant 0 : index
    %c0_29 = arith.constant 0 : index
    %53 = vector.load %arg3[%c8, %c0_28, %c0_29] : memref<9x8x4xbf16, #tpu.memory_space<vmem>>, vector<1x8x4xbf16>
    %54 = vector.shape_cast %53 : vector<1x8x4xbf16> to vector<8x4xbf16>
    %cst_30 = arith.constant dense<0.000000e+00> : vector<8x256xf32>
    %55 = tpu.matmul %54, %52, %cst_30 {dimension_numbers = #tpu.dot_dimension_numbers<[1], [0], [0], [1], [0, 0, 1, 1], [], []>} : vector<8x4xbf16>, vector<4x256xbf16>, vector<8x256xf32> -> vector<8x256xf32>
    %56 = arith.addf %50, %55 : vector<8x256xf32>
    %c0_31 = arith.constant 0 : index
    %c0_32 = arith.constant 0 : index
    %57 = vector.load %arg4[%c0_31, %c0_32] : memref<8x1xf32, #tpu.memory_space<vmem>>, vector<8x1xf32>
    %58 = vector.broadcast %57 : vector<8x1xf32> to vector<8x256xf32>
    %59 = arith.addf %56, %58 : vector<8x256xf32>
    %60 = arith.negf %59 : vector<8x256xf32>
    %61 = math.exp %60 : vector<8x256xf32>
    %cst_33 = arith.constant 1.000000e+00 : f32
    %62 = vector.broadcast %cst_33 : f32 to vector<8x256xf32>
    %63 = arith.addf %62, %61 : vector<8x256xf32>
    %64 = arith.divf %62, %63 : vector<8x256xf32>
    %65 = arith.mulf %59, %64 : vector<8x256xf32>
    %66 = arith.truncf %65 : vector<8x256xf32> to vector<8x256xbf16>
    %c0_34 = arith.constant 0 : index
    %c0_35 = arith.constant 0 : index
    %c0_36 = arith.constant 0 : index
    %67 = vector.load %arg5[%c0_34, %c0_35, %c0_36] : memref<1x8x256xbf16, #tpu.memory_space<vmem>>, vector<1x8x256xbf16>
    %68 = vector.shape_cast %67 : vector<1x8x256xbf16> to vector<8x256xbf16>
    %69 = vector.shape_cast %66 : vector<8x256xbf16> to vector<1x8x256xbf16>
    tpu.vector_store %arg5[%c0_34, %c0_35, %c0_36], %69 {strides = array<i32>} : memref<1x8x256xbf16, #tpu.memory_space<vmem>>, vector<1x8x256xbf16>,
    return
  }
  func.func @transform_0(%arg0: i32, %arg1: i32) -> (i32, i32, i32, i32) {
    %c0_i32 = arith.constant 0 : i32
    %c0_i32_0 = arith.constant 0 : i32
    %c0_i32_1 = arith.constant 0 : i32
    %c0_i32_2 = arith.constant 0 : i32
    return %arg0, %c0_i32, %c0_i32_0, %c0_i32_1 : i32, i32, i32, i32
  }
  func.func @transform_1(%arg0: i32, %arg1: i32) -> (i32, i32, i32) {
    %c0_i32 = arith.constant 0 : i32
    %c0_i32_0 = arith.constant 0 : i32
    %c0_i32_1 = arith.constant 0 : i32
    return %c0_i32, %arg1, %c0_i32_0 : i32, i32, i32
  }
  func.func @transform_2(%arg0: i32, %arg1: i32) -> (i32, i32) {
    %c0_i32 = arith.constant 0 : i32
    %c0_i32_0 = arith.constant 0 : i32
    return %arg1, %c0_i32 : i32, i32
  }
  func.func @transform_3(%arg0: i32, %arg1: i32) -> (i32, i32, i32) {
    %c0_i32 = arith.constant 0 : i32
    %c0_i32_0 = arith.constant 0 : i32
    return %arg0, %arg1, %c0_i32 : i32, i32, i32
  }
}

</mosaic_0001>

<bundles_post_ra>
// kernel: repconv_forward.1
= control target key start
LH: loop header
LB: loop body
LE: loop exit
PB: predicated region body
PF: predicated region fallthrough
CT: control target
= control target key end

     0   :  { %s3171_s12 = smov 0   ;;  %s3173_s13 = smov 0   ;;  %s4574_s0 = inlined_call_operand.vmem [shape: bf16[2,4,18,18], index: 0, kind: input, shape index: {}]   ;;  %s4575_s1 = inlined_call_operand.vmem [shape: bf16[9,8,4], index: 1, kind: input, shape index: {}]   ;;  %s4576_s2 = inlined_call_operand.vmem [shape: f32[8,1], index: 2, kind: input, shape index: {}]   ;;  %s4577_s3 = inlined_call_operand.vmem [shape: bf16[2,8,256], index: 3, kind: output, shape index: {}]  }
   0x1   :  { %s3175_s14 = smov 0  }
   0x2 LB: > { %s25_s15 = sadd.s32 1, %s3133_s13  ;;  %p3022_p0 = scmp.ge.s32.totalorder %s3137_s14, 1  ;;  %s3137_s14 = sphi %s3175_s14, %s13_s14   ;;  %s3133_s13 = sphi %s3173_s13, %s4583_s13   ;;  %s3129_s12 = sphi %s3171_s12, %s4582_s12  }
   0x3   : > { %p27_p1 = scmp.ge.s32.totalorder %s25_s15, 2  ;;  %p169_p2 = scmp.lt.s32.totalorder %s3137_s14, 3 }
   0x5   : > { %s4585_s15 = smov (%p27_p1, %s25_s15), 0  ;;  %p170_p3 = pnand %p3022_p0, %p169_p2 }
   0x6   : > { %p205_p4 = scmp.lt.s32.totalorder (!%p170_p3), %s3129_s12, 1  ;;  %s3141_s20 = smov (!%p170_p3), 64  }
   0x7   : > { %173 = sbr.rel (%p170_p3) target bundleno = 943 (0x3af), region = 32  ;;  %s3142_s21 = smov (!%p170_p3), 16  }
   0x8   : > { %s3143_s22 = smov (!%p170_p3), 32   ;;  %s3144_s23 = smov (!%p170_p3), 80  }
   0x9   : > { %s3145_s24 = smov (!%p170_p3), 112   ;;  %s3146_s25 = smov (!%p170_p3), 48  }
   0xa   : > { %s3147_s26 = smov (!%p170_p3), 96   ;;  %s3148_s27 = smov (!%p170_p3), 127  }
   0xb   : > { %s3149_s28 = smov (!%p170_p3), 126  }
   0xc   : > { %s4587_s12 = smov (!%p205_p4, %s3129_s12), 1  ;;  %v3139_v0 = vmov 1983009808   ;;  %v3140_v6 = vmov 1934713408   ;;  %vm275_vm0 = vcmask 1047556  }
   0xd   : > { %v266_v1 = vunpack.c.l.s4 %v3139_v0  ;;  %s3061_s16 = smul.u32 48, %s4587_s12  ;;  %v280_v7 = vunpack.c.l.s4 %v3140_v6  ;;  %vm439_vm1 = vcmask 130048   ;;  %vm443_vm2 = vcmask 261120  }
   0xe   : > { %vm446_vm3 = vcmask 392192   ;;  %vm449_vm4 = vcmask 523264   ;;  %vm452_vm5 = vcmask 654336   ;;  %vm455_vm6 = vcmask 785408  }
   0xf   : > { %s3195_s19 = scalar_lea.vmem %s4574_s0, %s3061_s16  ;;  %v3197_v2 = vunpack.c.0.s8 %v266_v1  ;;  %v3225_v18 = vunpack.c.0.s8 %v280_v7  ;;  %vm458_vm7 = vcmask 916480   ;;  %vm735_vm8 = vcmask 1041408  }
  0x10   : > { %v3200_v3 = vld [vmem:[%s3195_s19] sm:$0xf]  ;;  %v3203_v4 = vld [vmem:[%s3195_s19 + $0xc] sm:$0xf]  ;;  %v3206_v5 = vld [vmem:[%s3195_s19 + $0x18] sm:$0xf] }
  0x11   : > { %v3209_v8 = vld [vmem:[%s3195_s19 + $0x24] sm:$0xf]  ;;  %v242_v9 = vpack.i.b16 %v3203_v4, %v3200_v3  ;;  %v243_v10 = vshrl.u32 %v3200_v3, 16  ;;  %v244_v11 = vshrl.u32 %v3203_v4, 16  ;;  %v249_v12 = vshrl.u32 %v3206_v5, 16 }
  0x12   : > { %v248_v13 = vpack.i.b16 %v3209_v8, %v3206_v5  ;;  %v250_v14 = vshrl.u32 %v3209_v8, 16  ;;  %v3234_v23 = vld [vmem:[%s3195_s19 + $0x4] sm:$0xf]  ;;  %v3237_v24 = vld [vmem:[%s3195_s19 + $0x10] sm:$0xf]  ;;  %vm1994_vm12 = vcmask 1042432  }
  0x13   : > { %v268_v15 = vperm.slane %v242_v9, %v3197_v2  ;;  %v245_v16 = vpack.i.b16 %v244_v11, %v243_v10  ;;  %v3241_v26 = vld [vmem:[%s3195_s19 + $0x1c] sm:$0xf]  ;;  %v3247_v29 = vld [vmem:[%s3195_s19 + $0x28] sm:$0xf]  ;;  %v255_v30 = vshrl.u32 %v3234_v23, 16  ;;  %v256_v31 = vshrl.u32 %v3237_v24, 16 }
  0x14   : > { %v273_v17 = vperm.slane %v248_v13, %v3197_v2  ;;  %v251_v19 = vpack.i.b16 %v250_v14, %v249_v12  ;;  %v261_v34 = vshrl.u32 %v3241_v26, 16  ;;  %v262_v38 = vshrl.u32 %v3247_v29, 16 }
  0x15   : > { %v277_v20 = vrot.slane %v268_v15, 4  ;;  %v295_v21 = vperm.slane %v245_v16, %v3197_v2  ;;  %v257_v37 = vpack.i.b16 %v256_v31, %v255_v30  ;;  %v254_v49 = vpack.i.b16 %v3237_v24, %v3234_v23 }
  0x16   : > { %v300_v22 = vperm.slane %v251_v19, %v3197_v2  ;;  %v274_v39 = vrot.slane %v273_v17, 4  ;;  %v263_v41 = vpack.i.b16 %v262_v38, %v261_v34  ;;  %v260_v50 = vpack.i.b16 %v3247_v29, %v3241_v26 }
  0x17   : > { %v278_v25 = vsel %vm275_vm0, %v273_v17, %v277_v20  ;;  %v303_v43 = vrot.slane %v295_v21, 4  ;;  %v347_v44 = vperm.slane %v257_v37, %v3197_v2  ;;  %v321_v55 = vperm.slane %v254_v49, %v3197_v2 }
  0x18   : > { %v3244_v27 = vperm.slane %v278_v25, %v3225_v18  ;;  %v301_v28 = vrot.slane %v300_v22, 4  ;;  %v352_v45 = vperm.slane %v263_v41, %v3197_v2  ;;  %v276_v46 = vsel %vm275_vm0, %v274_v39, %v268_v15 }
  0x19   : > { %v3270_v48 = vperm.slane %v276_v46, %v3225_v18  ;;  %v304_v53 = vsel %vm275_vm0, %v300_v22, %v303_v43  ;;  %v326_v57 = vperm.slane %v260_v50, %v3197_v2  ;;  %v355_v59 = vrot.slane %v347_v44, 4 }
  0x1a   : > { %v385_v32 = vunpack.c.l.b16 %v3244_v27  ;;  %v302_v33 = vsel %vm275_vm0, %v301_v28, %v295_v21  ;;  %v353_v47 = vrot.slane %v352_v45, 4  ;;  %v312_v58 = vperm.slane %v304_v53, %v3225_v18 }
  0x1b   : > { %v308_v35 = vperm.slane %v302_v33, %v3225_v18  ;;  %v287_v52 = vrot.slane %v3270_v48, 4  ;;  %v329_v62 = vrot.slane %v321_v55, 4  ;;  %v327_v9 = vrot.slane %v326_v57, 4 }
  0x1c   : > { %v386_v36 = vpack.c.b16 %v385_v32, %v385_v32  ;;  %v354_v51 = vsel %vm275_vm0, %v353_v47, %v347_v44  ;;  %v315_v63 = vrot.slane %v312_v58, 4  ;;  %v390_v0 = vunpack.c.l.b16 %v312_v58 }
  0x1d   : > { %v370_v40 = vunpack.c.l.b16 %v308_v35  ;;  %v360_v54 = vperm.slane %v354_v51, %v3225_v18  ;;  %v288_v56 = vsel %vm275_vm0, 0, %v287_v52  ;;  %v330_v7 = vsel %vm275_vm0, %v326_v57, %v329_v62 }
  0x1e   : > { %387 = vrot.lane.b32.xlu1 %v386_v36, %s3141_s20  ;;  %v375_v61 = vunpack.c.l.b16 %v288_v56  ;;  %v338_v13 = vperm.slane %v330_v7, %v3225_v18  ;;  %v316_v15 = vsel %vm275_vm0, 0, %v315_v63  ;;  %v391_v16 = vpack.c.b16 %v390_v0, %v390_v0 }
  0x1f   : > { %v371_v42 = vpack.c.b16 %v370_v40, %v370_v40  ;;  %v405_v60 = vunpack.c.l.b16 %v360_v54  ;;  %v400_v17 = vunpack.c.l.b16 %v316_v15  ;;  %v356_v19 = vsel %vm275_vm0, %v352_v45, %v355_v59 }
  0x20   : > { %v376_v6 = vpack.c.b16 %v375_v61, %v375_v61  ;;  %v313_v20 = vrot.slane %v308_v35, 4  ;;  %v420_v21 = vunpack.c.l.b16 %v338_v13  ;;  %392 = vrot.lane.b32.xlu2 %v391_v16, %s3144_s23  ;;  %v365_v22 = vrot.slane %v360_v54, 4 }
  0x21   : > { %372 = vrot.lane.b32.xlu0 %v371_v42, %s3142_s21  ;;  %v406_v1 = vpack.c.b16 %v405_v60, %v405_v60  ;;  %v364_v25 = vperm.slane %v356_v19, %v3225_v18  ;;  %v289_v28 = vrot.slane %v3244_v27, 4  ;;  %v328_v33 = vsel %vm275_vm0, %v327_v9, %v321_v55 }
  0x22   : > { %v421_v36 = vpack.c.b16 %v420_v21, %v420_v21  ;;  %v401_v37 = vpack.c.b16 %v400_v17, %v400_v17  ;;  %v314_v39 = vsel %vm275_vm0, 0, %v313_v20  ;;  %v366_v40 = vsel %vm275_vm0, 0, %v365_v22 }
  0x23   : > { %v425_v32 = vunpack.c.l.b16 %v364_v25  ;;  %v290_v35 = vsel %vm275_vm0, 0, %v289_v28  ;;  %v334_v42 = vperm.slane %v328_v33, %v3225_v18  ;;  %v380_v27 = vunpack.c.l.b16 %v314_v39 }
  0x24   : > { %v415_v43 = vunpack.c.l.b16 %v366_v40  ;;  %v367_v44 = vrot.slane %v364_v25, 4  ;;  %v341_v45 = vrot.slane %v338_v13, 4  ;;  %v395_v46 = vunpack.c.l.b16 %v290_v35 }
  0x25   : > { %v426_v41 = vpack.c.b16 %v425_v32, %v425_v32  ;;  %v339_v47 = vrot.slane %v334_v42, 4  ;;  %v381_v49 = vpack.c.b16 %v380_v27, %v380_v27  ;;  %vm1080_vm9 = vsmask.f32 3328 }
  0x26   : > { %407 = vrot.lane.b32.xlu1 %v406_v1, %s3142_s21  ;;  %v416_v50 = vpack.c.b16 %v415_v43, %v415_v43  ;;  %v368_v51 = vsel %vm275_vm0, 0, %v367_v44  ;;  %v342_v52 = vsel %vm275_vm0, 0, %v341_v45  ;;  %v396_v53 = vpack.c.b16 %v395_v46, %v395_v46 }
  0x27   : > { %v340_v54 = vsel %vm275_vm0, 0, %v339_v47  ;;  %v435_v55 = vunpack.c.l.b16 %v368_v51  ;;  %v430_v56 = vunpack.c.l.b16 %v342_v52  ;;  %vm1081_vm10 = vsmask.f32 7440 }
  0x28   : > { %427 = vrot.lane.b32.xlu2 %v426_v41, %s3144_s23  ;;  %v410_v57 = vunpack.c.l.b16 %v340_v54  ;;  %vm3519_vm11 = vmor %vm1080_vm9, %vm1081_vm10  ;;  %vm1995_vm13 = vcmask 1046532   ;;  %vm731_vm15 = vcmask 31744  }
  0x29   : > { %377 = vrot.lane.b32.xlu0 %v376_v6, %s3143_s22  ;;  %v436_v58 = vpack.c.b16 %v435_v55, %v435_v55  ;;  %v431_v59 = vpack.c.b16 %v430_v56, %v430_v56  ;;  %vm3778_vm14 = vmor %vm1994_vm12, %vm1995_vm13 }
  0x2a   : > { %v411_v60 = vpack.c.b16 %v410_v57, %v410_v57 }
  0x2e   : > { %422 = vrot.lane.b32.xlu1 %v421_v36, %s3141_s20 }
  0x30   : > { %397 = vrot.lane.b32.xlu2 %v396_v53, %s3147_s26 }
  0x31   : > { %402 = vrot.lane.b32.xlu0 %v401_v37, %s3145_s24 }
  0x36   : > { %382 = vrot.lane.b32.xlu1 %v381_v49, %s3146_s25 }
  0x38   : > { %412 = vrot.lane.b32.xlu2 %v411_v60, %s3143_s22 }
  0x39   : > { %417 = vrot.lane.b32.xlu0 %v416_v50, %s3146_s25 }
  0x3e   : > { %437 = vrot.lane.b32.xlu1 %v436_v58, %s3145_s24 }
  0x40   : > { %485 = vrot.lane.b32.xlu2 %v3200_v3, %s3148_s27 }
  0x41   : > { %432 = vrot.lane.b32.xlu0 %v431_v59, %s3147_s26 }
  0x46   : > { %489 = vrot.lane.b32.xlu1 %v3203_v4, %s3148_s27 }
  0x48   : > { %491 = vrot.lane.b32.xlu2 %v3237_v24, %s3148_s27 }
  0x49   : > { %487 = vrot.lane.b32.xlu0 %v3234_v23, %s3148_s27 }
  0x4e   : > { %495 = vrot.lane.b32.xlu1 %v3241_v26, %s3148_s27 }
  0x50   : > { %497 = vrot.lane.b32.xlu2 %v3209_v8, %s3148_s27 }
  0x51   : > { %493 = vrot.lane.b32.xlu0 %v3206_v5, %s3148_s27 }
  0x56   : > { %801 = vrot.lane.b32.xlu1 %v3234_v23, %s3149_s28 }
  0x58   : > { %803 = vrot.lane.b32.xlu2 %v3203_v4, %s3149_s28 }
  0x59   : > { %499 = vrot.lane.b32.xlu0 %v3247_v29, %s3148_s27 }
  0x5e   : > { %807 = vrot.lane.b32.xlu1 %v3206_v5, %s3149_s28 }
  0x60   : > { %809 = vrot.lane.b32.xlu2 %v3241_v26, %s3149_s28 }
  0x61   : > { %799 = vrot.lane.b32.xlu0 %v3200_v3, %s3149_s28 }
  0x66   : > { %813 = vrot.lane.b32.xlu1 %v3247_v29, %s3149_s28 }
  0x69   : > { %805 = vrot.lane.b32.xlu0 %v3237_v24, %s3149_s28 }
  0x71   : > { %811 = vrot.lane.b32.xlu0 %v3209_v8, %s3149_s28 }
  0x7a   : > { %v393_v61 = vpop.permute.xlu2 %392 }
  0x82   : > { %v428_v62 = vpop.permute.xlu2 %427 }
  0x8a   : > { %v398_v1 = vpop.permute.xlu2 %397 }
  0x90   : > { %v388_v63 = vpop.permute.xlu1 %387 }
  0x92   : > { %v413_v9 = vpop.permute.xlu2 %412 }
  0x93   : > { %v373_v0 = vpop.permute.xlu0 %372 }
  0x94   : > { %v442_v17 = vsel %vm439_vm1, %v3270_v48, %v373_v0 }
  0x98   : > { %v408_v6 = vpop.permute.xlu1 %407 }
  0x99   : > { %v463_v16 = vsel %vm439_vm1, %v334_v42, %v408_v6 }
  0x9a   : > { %v465_v19 = vsel %vm443_vm2, %v463_v16, %v413_v9  ;;  %v486_v20 = vpop.permute.xlu2 %485 }
  0x9b   : > { %v378_v7 = vpop.permute.xlu0 %377  ;;  %v504_v52 = vshrl.u32 %v486_v20, 16 }
  0x9c   : > { %v445_v21 = vsel %vm443_vm2, %v442_v17, %v378_v7 }
  0xa0   : > { %v423_v13 = vpop.permute.xlu1 %422 }
  0xa2   : > { %v492_v44 = vpop.permute.xlu2 %491 }
  0xa3   : > { %v403_v15 = vpop.permute.xlu0 %402  ;;  %v517_v55 = vshrl.u32 %v492_v44, 16 }
  0xa8   : > { %v383_v22 = vpop.permute.xlu1 %382 }
  0xa9   : > { %v448_v28 = vsel %vm446_vm3, %v445_v21, %v383_v22 }
  0xaa   : > { %v451_v32 = vsel %vm449_vm4, %v448_v28, %v388_v63  ;;  %v498_v50 = vpop.permute.xlu2 %497 }
  0xab   : > { %v418_v25 = vpop.permute.xlu0 %417  ;;  %v454_v36 = vsel %vm452_vm5, %v451_v32, %v393_v61  ;;  %v511_v54 = vshrl.u32 %v498_v50, 16 }
  0xac   : > { %v467_v33 = vsel %vm446_vm3, %v465_v19, %v418_v25  ;;  %v457_v48 = vsel %vm455_vm6, %v454_v36, %v398_v1 }
  0xad   : > { %v469_v37 = vsel %vm449_vm4, %v467_v33, %v423_v13  ;;  %v460_v39 = vsel %vm458_vm7, %v457_v48, %v403_v15 }
  0xae   : > { %v769_v40 = vsel %vm735_vm8, %v460_v39, 0  ;;  %v471_v35 = vsel %vm452_vm5, %v469_v37, %v428_v62 }
  0xaf   : > { %780 = vmatpush.bf16.msra.mxu2 %v769_v40 }
  0xb0   : > { %v438_v41 = vpop.permute.xlu1 %437 }
  0xb3   : > { %v433_v42 = vpop.permute.xlu0 %432 }
  0xb4   : > { %v473_v27 = vsel %vm455_vm6, %v471_v35, %v433_v42 }
  0xb5   : > { %v475_v43 = vsel %vm458_vm7, %v473_v27, %v438_v41  ;;  %v804_v41 = vpop.permute.xlu2 %803 }
  0xb6   : > { %v771_v45 = vsel %vm735_vm8, %v475_v43, 0 }
  0xb7   : > { %793 = vmatpush.bf16.msra.mxu3 %v771_v45 }
  0xb8   : > { %v490_v46 = vpop.permute.xlu1 %489 }
  0xb9   : > { %v503_v49 = vpack.i.b16 %v490_v46, %v486_v20  ;;  %v505_v53 = vshrl.u32 %v490_v46, 16 }
  0xbb   : > { %v488_v47 = vpop.permute.xlu0 %487  ;;  %v3360_v51 = vperm.slane %v503_v49, %v3197_v2  ;;  %v506_v62 = vpack.i.b16 %v505_v53, %v504_v52 }
  0xbc   : > { %v516_v59 = vshrl.u32 %v488_v47, 16  ;;  %v515_v63 = vpack.i.b16 %v492_v44, %v488_v47 }
  0xbd   : > { %v537_v58 = vrot.slane %v3360_v51, 4  ;;  %v3375_v15 = vperm.slane %v506_v62, %v3197_v2 }
  0xbe   : > { %v518_v6 = vpack.i.b16 %v517_v55, %v516_v59  ;;  %v3378_v16 = vperm.slane %v515_v63, %v3197_v2 }
  0xc0   : > { %v496_v56 = vpop.permute.xlu1 %495  ;;  %v3383_v25 = vperm.slane %v518_v6, %v3197_v2  ;;  %v589_v37 = vrot.slane %v3378_v16, 4 }
  0xc1   : > { %v522_v17 = vshrl.u32 %v496_v56, 16 }
  0xc2   : > { %v615_v35 = vrot.slane %v3383_v25, 4 }
  0xc3   : > { %v494_v57 = vpop.permute.xlu0 %493 }
  0xc4   : > { %v509_v60 = vpack.i.b16 %v498_v50, %v494_v57  ;;  %v510_v61 = vshrl.u32 %v494_v57, 16 }
  0xc6   : > { %v512_v0 = vpack.i.b16 %v511_v54, %v510_v61  ;;  %v3364_v1 = vperm.slane %v509_v60, %v3197_v2  ;;  %v819_v60 = vshrl.u32 %v804_v41, 16 }
  0xc8   : > { %v3367_v7 = vperm.slane %v512_v0, %v3197_v2  ;;  %v538_v9 = vsel %vm275_vm0, %v3364_v1, %v537_v58  ;;  %v802_v20 = vpop.permute.xlu1 %801  ;;  %v810_v58 = vpop.permute.xlu2 %809 }
  0xc9   : > { %v3372_v13 = vperm.slane %v538_v9, %v3225_v18  ;;  %v836_v9 = vshrl.u32 %v810_v58, 16 }
  0xca   : > { %v561_v19 = vrot.slane %v3367_v7, 4 }
  0xcb   : > { %v500_v21 = vpop.permute.xlu0 %499  ;;  %v645_v22 = vunpack.c.l.b16 %v3372_v13 }
  0xcc   : > { %v521_v28 = vpack.i.b16 %v500_v21, %v496_v56  ;;  %v523_v32 = vshrl.u32 %v500_v21, 16  ;;  %v562_v33 = vsel %vm275_vm0, %v561_v19, %v3375_v15 }
  0xcd   : > { %v646_v36 = vpack.c.b16 %v645_v22, %v645_v22  ;;  %v3388_v48 = vperm.slane %v562_v33, %v3225_v18 }
  0xce   : > { %v524_v39 = vpack.i.b16 %v523_v32, %v522_v17  ;;  %v3392_v40 = vperm.slane %v521_v28, %v3197_v2 }
  0xcf   : > { %647 = vrot.lane.b32.xlu1 %v646_v36, %s3141_s20  ;;  %v630_v43 = vunpack.c.l.b16 %v3388_v48  ;;  %v830_v36 = vshrl.u32 %v802_v20, 16 }
  0xd0   : > { %v3397_v42 = vperm.slane %v524_v39, %v3197_v2  ;;  %v590_v27 = vsel %vm275_vm0, %v3392_v40, %v589_v37  ;;  %v808_v46 = vpop.permute.xlu1 %807 }
  0xd1   : > { %v598_v44 = vperm.slane %v590_v27, %v3225_v18  ;;  %v631_v53 = vpack.c.b16 %v630_v43, %v630_v43  ;;  %v824_v27 = vshrl.u32 %v808_v46, 16 }
  0xd2   : > { %v616_v45 = vsel %vm275_vm0, %v3397_v42, %v615_v35 }
  0xd3   : > { %v800_v47 = vpop.permute.xlu0 %799  ;;  %v680_v49 = vunpack.c.l.b16 %v598_v44  ;;  %v3406_v50 = vperm.slane %v616_v45, %v3225_v18  ;;  %v601_v52 = vrot.slane %v598_v44, 4 }
  0xd4   : > { %v818_v61 = vshrl.u32 %v800_v47, 16  ;;  %v817_v19 = vpack.i.b16 %v804_v41, %v800_v47 }
  0xd5   : > { %v681_v54 = vpack.c.b16 %v680_v49, %v680_v49  ;;  %v685_v55 = vunpack.c.l.b16 %v3406_v50  ;;  %v602_v56 = vsel %vm275_vm0, 0, %v601_v52 }
  0xd6   : > { %v690_v59 = vunpack.c.l.b16 %v602_v56  ;;  %v820_v28 = vpack.i.b16 %v819_v60, %v818_v61  ;;  %v3418_v37 = vperm.slane %v817_v19, %v3197_v2 }
  0xd7   : > { %632 = vrot.lane.b32.xlu1 %v631_v53, %s3142_s21  ;;  %682 = vrot.lane.b32.xlu2 %v681_v54, %s3141_s20  ;;  %v686_v57 = vpack.c.b16 %v685_v55, %v685_v55 }
  0xd8   : > { %v814_v62 = vpop.permute.xlu1 %813  ;;  %v691_v17 = vpack.c.b16 %v690_v59, %v690_v59  ;;  %v3425_v41 = vperm.slane %v820_v28, %v3197_v2  ;;  %v851_v52 = vrot.slane %v3418_v37, 4 }
  0xd9   : > { %687 = vrot.lane.b32.xlu0 %v686_v57, %s3144_s23  ;;  %v837_v0 = vshrl.u32 %v814_v62, 16  ;;  %v835_v6 = vpack.i.b16 %v814_v62, %v810_v58 }
  0xda   : > { %v877_v56 = vrot.slane %v3425_v41, 4 }
  0xdb   : > { %v806_v63 = vpop.permute.xlu0 %805  ;;  %v3414_v21 = vperm.slane %v835_v6, %v3197_v2  ;;  %v838_v32 = vpack.i.b16 %v837_v0, %v836_v9 }
  0xdc   : > { %v829_v22 = vpack.i.b16 %v806_v63, %v802_v20  ;;  %v831_v33 = vshrl.u32 %v806_v63, 16  ;;  %v563_v20 = vrot.slane %v3375_v15, 4  ;;  %v1125_v63 = vshll.u32 %v3206_v5, 16 }
  0xdd   : > { %v901_v39 = vrot.slane %v3414_v21, 4  ;;  %v3428_v44 = vperm.slane %v838_v32, %v3197_v2 }
  0xde   : > { %v3422_v35 = vperm.slane %v829_v22, %v3197_v2  ;;  %v832_v45 = vpack.i.b16 %v831_v33, %v830_v36  ;;  %v564_v60 = vsel %vm275_vm0, %v3367_v7, %v563_v20  ;;  %v1105_v36 = vshll.u32 %v3203_v4, 16 }
  0xdf   : > { %692 = vrot.lane.b32.xlu1 %v691_v17, %s3147_s26  ;;  %v927_v57 = vrot.slane %v3428_v44, 4  ;;  %v1085_v17 = vshll.u32 %v3200_v3, 16  ;;  %v572_v19 = vperm.slane %v564_v60, %v3225_v18  ;;  %v1104_v3 = vrot.slane %v244_v11, 4 }
  0xe0   : > { %v902_v55 = vsel %vm275_vm0, %v901_v39, %v3422_v35  ;;  %v3440_v58 = vperm.slane %v832_v45, %v3197_v2  ;;  %v1145_v39 = vshll.u32 %v3209_v8, 16  ;;  %v1124_v45 = vrot.slane %v249_v12, 4 }
  0xe1   : > { %v3451_v61 = vperm.slane %v902_v55, %v3225_v18  ;;  %v587_v55 = vrot.slane %v3392_v40, 4  ;;  %v1087_v5 = vrot.slane %v1085_v17, 5  ;;  %v1144_v12 = vrot.slane %v250_v14, 4 }
  0xe2   : > { %v928_v7 = vsel %vm275_vm0, %v927_v57, %v3440_v58  ;;  %v1147_v57 = vrot.slane %v1145_v39, 5  ;;  %v535_v60 = vrot.slane %v3364_v1, 4  ;;  %v1130_v4 = vshll.u32 %v3241_v26, 16 }
  0xe3   : > { %v812_v43 = vpop.permute.xlu0 %811  ;;  %v913_v33 = vrot.slane %v3451_v61, 4  ;;  %v3473_v20 = vperm.slane %v928_v7, %v3225_v18  ;;  %v1150_v1 = vshll.u32 %v3247_v29, 16 }
  0xe4   : > { %v823_v47 = vpack.i.b16 %v812_v43, %v808_v46  ;;  %v825_v49 = vshrl.u32 %v812_v43, 16  ;;  %v1148_v17 = vor.u32 %v1147_v57, %v1144_v12  ;;  %v536_v39 = vsel %vm275_vm0, %v535_v60, %v3360_v51 }
  0xe5   : > { %v3517_v51 = vperm.slane %v536_v39, %v3225_v18 }
  0xe6   : > { %v826_v53 = vpack.i.b16 %v825_v49, %v824_v27  ;;  %v3433_v54 = vperm.slane %v823_v47, %v3197_v2  ;;  %v613_v27 = vrot.slane %v3397_v42, 4  ;;  %v1127_v47 = vrot.slane %v1125_v63, 5 }
  0xe7   : > { %v650_v42 = vunpack.c.l.b16 %v572_v19  ;;  %v549_v63 = vrot.slane %v3372_v13, 4 }
  0xe8   : > { %v3443_v46 = vperm.slane %v826_v53, %v3197_v2  ;;  %v852_v15 = vsel %vm275_vm0, %v3433_v54, %v851_v52  ;;  %v1084_v53 = vrot.slane %v243_v10, 4  ;;  %v1107_v10 = vrot.slane %v1105_v36, 5 }
  0xe9   : > { %v860_v59 = vperm.slane %v852_v15, %v3225_v18  ;;  %v614_v15 = vsel %vm275_vm0, %v613_v27, %v3383_v25  ;;  %v1128_v40 = vor.u32 %v1127_v47, %v1124_v45  ;;  %v651_v8 = vpack.c.b16 %v650_v42, %v650_v42 }
  0xea   : > { %v878_v62 = vsel %vm275_vm0, %v3443_v46, %v877_v56  ;;  %v914_v56 = vsel %vm275_vm0, 0, %v913_v33  ;;  %v620_v14 = vperm.slane %v614_v15, %v3225_v18  ;;  %v1088_v25 = vor.u32 %v1087_v5, %v1084_v53 }
  0xeb   : > { %v959_v0 = vunpack.c.l.b16 %v860_v59  ;;  %v3457_v6 = vperm.slane %v878_v62, %v3225_v18  ;;  %v863_v9 = vrot.slane %v860_v59, 4  ;;  %v979_v59 = vunpack.c.l.b16 %v3473_v20 }
  0xec   : > { %v984_v62 = vunpack.c.l.b16 %v914_v56  ;;  %v875_v11 = vrot.slane %v3443_v46, 4  ;;  %v1108_v7 = vor.u32 %v1107_v10, %v1104_v3  ;;  %v849_v33 = vrot.slane %v3433_v54, 4 }
  0xed   : > { %v960_v22 = vpack.c.b16 %v959_v0, %v959_v0  ;;  %v964_v28 = vunpack.c.l.b16 %v3457_v6  ;;  %v864_v32 = vsel %vm275_vm0, 0, %v863_v9  ;;  %v575_v0 = vrot.slane %v572_v19, 4 }
  0xee   : > { %v969_v43 = vunpack.c.l.b16 %v864_v32  ;;  %v588_v9 = vsel %vm275_vm0, %v587_v55, %v3378_v16  ;;  %v980_v13 = vpack.c.b16 %v979_v59, %v979_v59  ;;  %v985_v32 = vpack.c.b16 %v984_v62, %v984_v62 }
  0xef   : > { %961 = vrot.lane.b32.xlu2 %v960_v22, %s3141_s20  ;;  %v965_v49 = vpack.c.b16 %v964_v28, %v964_v28  ;;  %v1129_v22 = vrot.slane %v1128_v40, 4  ;;  %v1090_v28 = vshll.u32 %v3234_v23, 16  ;;  %v550_v19 = vsel %vm275_vm0, 0, %v549_v63 }
  0xf0   : > { %v970_v52 = vpack.c.b16 %v969_v43, %v969_v43  ;;  %v3500_v16 = vperm.slane %v588_v9, %v3225_v18  ;;  %v665_v46 = vunpack.c.l.b16 %v620_v14  ;;  %v576_v36 = vsel %vm275_vm0, 0, %v575_v0 }
  0xf1   : > { %966 = vrot.lane.b32.xlu0 %v965_v49, %s3144_s23  ;;  %v1149_v27 = vrot.slane %v1148_v17, 4  ;;  %v1110_v43 = vshll.u32 %v3237_v24, 16  ;;  %v3508_v45 = vrot.slane %v1130_v4, 5  ;;  %v876_v47 = vsel %vm275_vm0, %v875_v11, %v3425_v41 }
  0xf2   : > { %971 = vrot.lane.b32.xlu1 %v970_v52, %s3147_s26  ;;  %v3513_v49 = vrot.slane %v1150_v1, 5  ;;  %v655_v54 = vunpack.c.l.b16 %v550_v19  ;;  %v660_v52 = vunpack.c.l.b16 %v576_v36  ;;  %v599_v53 = vrot.slane %v3500_v16, 4 }
  0xf3   : > { %v666_v42 = vpack.c.b16 %v665_v46, %v665_v46  ;;  %v882_v56 = vperm.slane %v876_v47, %v3225_v18  ;;  %v625_v5 = vrot.slane %v620_v14, 4  ;;  %v850_v41 = vsel %vm275_vm0, %v849_v33, %v3418_v37 }
  0xf4   : > { %v1089_v12 = vrot.slane %v1088_v25, 4  ;;  %v1109_v57 = vrot.slane %v1108_v7, 4  ;;  %v1092_v15 = vrot.slane %v1090_v28, 5  ;;  %v3526_v3 = vrot.slane %v1110_v43, 5 }
  0xf5   : > { %v656_v10 = vpack.c.b16 %v655_v54, %v655_v54  ;;  %v3532_v40 = vsel %vm3519_vm11, %v1129_v22, %v3508_v45  ;;  %v3537_v59 = vsel %vm3519_vm11, %v1149_v27, %v3513_v49  ;;  %v661_v60 = vpack.c.b16 %v660_v52, %v660_v52 }
  0xf6   : > { %v600_v37 = vsel %vm275_vm0, 0, %v599_v53  ;;  %v3541_v62 = vperm.slane %v850_v41, %v3225_v18  ;;  %v944_v63 = vunpack.c.l.b16 %v882_v56  ;;  %v547_v14 = vrot.slane %v3517_v51, 4 }
  0xf7   : > { %652 = vrot.lane.b32.xlu2 %v651_v8, %s3144_s23  ;;  %v626_v8 = vsel %vm275_vm0, 0, %v625_v5  ;;  %v1095_v0 = vrot.slane %v255_v30, 4  ;;  %v1172_v9 = vshrl.u32 %v3532_v40, 16  ;;  %v1173_v25 = vshrl.u32 %v3537_v59, 16 }
  0xf8   : > { %v1135_v17 = vrot.slane %v261_v34, 4  ;;  %v670_v4 = vunpack.c.l.b16 %v600_v37  ;;  %v3555_v11 = vsel %vm3519_vm11, %v1089_v12, %v1092_v15  ;;  %v3560_v7 = vsel %vm3519_vm11, %v1109_v57, %v3526_v3  ;;  %v3592_v12 = vld [vmem:[%s3195_s19 + $0x20] sm:$0x1]  ;;  %v3595_v57 = vld [vmem:[%s3195_s19 + $0x2c] sm:$0x1] }
  0xf9   : > { %981 = vrot.lane.b32.xlu0 %v980_v13, %s3142_s21  ;;  %v1155_v23 = vrot.slane %v262_v38, 4  ;;  %v675_v30 = vunpack.c.l.b16 %v626_v8  ;;  %v861_v22 = vrot.slane %v3541_v62, 4  ;;  %v887_v1 = vrot.slane %v882_v56, 4 }
  0xfa   : > { %986 = vrot.lane.b32.xlu1 %v985_v32, %s3143_s22  ;;  %v945_v13 = vpack.c.b16 %v944_v63, %v944_v63  ;;  %v548_v26 = vsel %vm275_vm0, 0, %v547_v14  ;;  %v929_v34 = vrot.slane %v3440_v58, 4  ;;  %v1166_v28 = vshrl.u32 %v3555_v11, 16 }
  0xfb   : > { %v1167_v32 = vshrl.u32 %v3560_v7, 16  ;;  %v1174_v19 = vpack.i.b16 %v1173_v25, %v1172_v9  ;;  %v1096_v33 = vor.u32 %v1095_v0, %v1092_v15  ;;  %v1115_v46 = vrot.slane %v256_v31, 4  ;;  %v3606_v0 = vld [vmem:[%s3195_s19 + $0x8] sm:$0x1]  ;;  %v3609_v9 = vld [vmem:[%s3195_s19 + $0x14] sm:$0x1] }
  0xfc   : > { %v1136_v29 = vor.u32 %v1135_v17, %v3508_v45  ;;  %v671_v38 = vpack.c.b16 %v670_v4, %v670_v4  ;;  %v1156_v36 = vor.u32 %v1155_v23, %v3513_v49  ;;  %v676_v39 = vpack.c.b16 %v675_v30, %v675_v30 }
  0xfd   : > { %v862_v27 = vsel %vm275_vm0, 0, %v861_v22  ;;  %v888_v58 = vsel %vm275_vm0, 0, %v887_v1  ;;  %v635_v43 = vunpack.c.l.b16 %v548_v26  ;;  %v627_v47 = vrot.slane %v3406_v50, 4 }
  0xfe   : > { %v573_v24 = vrot.slane %v3388_v48, 4  ;;  %v930_v31 = vsel %vm275_vm0, %v3428_v44, %v929_v34  ;;  %v1168_v45 = vpack.i.b16 %v1167_v32, %v1166_v28  ;;  %v3583_v49 = vperm.slane %v1174_v19, %v3197_v2 }
  0xff   : > { %667 = vrot.lane.b32.xlu2 %v666_v42, %s3142_s21  ;;  %v949_v54 = vunpack.c.l.b16 %v862_v27  ;;  %v954_v52 = vunpack.c.l.b16 %v888_v58  ;;  %v1097_v53 = vrot.slane %v1096_v33, 4  ;;  %v1116_v42 = vor.u32 %v1115_v46, %v3526_v3 }
 0x100   : > { %v1137_v56 = vrot.slane %v1136_v29, 4  ;;  %v1157_v50 = vrot.slane %v1156_v36, 4  ;;  %v636_v5 = vpack.c.b16 %v635_v43, %v635_v43  ;;  %v628_v48 = vsel %vm275_vm0, 0, %v627_v47 }
 0x101   : > { %657 = vrot.lane.b32.xlu0 %v656_v10, %s3147_s26  ;;  %v574_v41 = vsel %vm275_vm0, 0, %v573_v24  ;;  %v3589_v44 = vperm.slane %v930_v31, %v3225_v18  ;;  %v1217_v15 = vperm.slane %v1168_v45, %v3197_v2  ;;  %v1223_v3 = vrot.slane %v3583_v49, 4 }
 0x102   : > { %662 = vrot.lane.b32.xlu1 %v661_v60, %s3145_s24  ;;  %v1139_v10 = vshll.u32 %v3592_v12, 16  ;;  %v1159_v60 = vshll.u32 %v3595_v57, 16  ;;  %v903_v37 = vrot.slane %v3422_v35, 4  ;;  %v950_v63 = vpack.c.b16 %v949_v54, %v949_v54 }
 0x103   : > { %v955_v8 = vpack.c.b16 %v954_v52, %v954_v52  ;;  %v1165_v14 = vpack.i.b16 %v3560_v7, %v3555_v11  ;;  %v1099_v25 = vshll.u32 %v3606_v0, 16  ;;  %v1119_v17 = vshll.u32 %v3609_v9, 16 }
 0x104   : > { %v1141_v4 = vrot.slane %v1139_v10, 5  ;;  %v1161_v23 = vrot.slane %v1159_v60, 5  ;;  %v1117_v30 = vrot.slane %v1116_v42, 4  ;;  %v695_v35 = vunpack.c.l.b16 %v628_v48 }
 0x105   : > { %v640_v22 = vunpack.c.l.b16 %v574_v41  ;;  %v999_v1 = vunpack.c.l.b16 %v3589_v44  ;;  %v1224_v26 = vsel %vm275_vm0, %v1223_v3, %v1217_v15  ;;  %v1101_v34 = vrot.slane %v1099_v25, 5 }
 0x106   : > { %v1121_v28 = vrot.slane %v1119_v17, 5  ;;  %v1171_v32 = vpack.i.b16 %v3537_v59, %v3532_v40  ;;  %v1191_v19 = vperm.slane %v1165_v14, %v3197_v2  ;;  %v3623_v33 = vsel %vm3519_vm11, %v1137_v56, %v1141_v4 }
 0x107   : > { %946 = vrot.lane.b32.xlu2 %v945_v13, %s3142_s21  ;;  %v889_v13 = vrot.slane %v3457_v6, 4  ;;  %v3627_v46 = vsel %vm3519_vm11, %v1157_v50, %v1161_v23  ;;  %v904_v6 = vsel %vm275_vm0, %v3414_v21, %v903_v37  ;;  %v696_v29 = vpack.c.b16 %v695_v35, %v695_v35 }
 0x108   : > { %v3637_v36 = vsel %vm3519_vm11, %v1117_v30, %v1121_v28  ;;  %v641_v27 = vpack.c.b16 %v640_v22, %v640_v22  ;;  %v1230_v43 = vperm.slane %v1224_v26, %v3225_v18  ;;  %v1185_v47 = vshrl.u32 %v3627_v46, 16 }
 0x109   : > { %672 = vrot.lane.b32.xlu0 %v671_v38, %s3143_s22  ;;  %v3633_v38 = vsel %vm3519_vm11, %v1097_v53, %v1101_v34  ;;  %v890_v58 = vsel %vm275_vm0, 0, %v889_v13  ;;  %v1000_v21 = vpack.c.b16 %v999_v1, %v999_v1  ;;  %v912_v24 = vperm.slane %v904_v6, %v3225_v18 }
 0x10a   : > { %677 = vrot.lane.b32.xlu1 %v676_v39, %s3146_s25  ;;  %v1184_v39 = vshrl.u32 %v3623_v33, 16  ;;  %v1196_v31 = vperm.slane %v1171_v32, %v3197_v2  ;;  %v1199_v45 = vrot.slane %v1191_v19, 4  ;;  %v1225_v55 = vrot.slane %v1217_v15, 4 }
 0x10b   : > { %v1178_v54 = vshrl.u32 %v3633_v38, 16  ;;  %v1179_v52 = vshrl.u32 %v3637_v36, 16  ;;  %v974_v42 = vunpack.c.l.b16 %v890_v58  ;;  %v1292_v56 = vunpack.c.l.b16 %v1230_v43 }
 0x10c   : > { %v1186_v53 = vpack.i.b16 %v1185_v47, %v1184_v39  ;;  %v939_v50 = vrot.slane %v3473_v20, 4  ;;  %v1200_v48 = vsel %vm275_vm0, %v1196_v31, %v1199_v45  ;;  %v941_v41 = vrot.slane %v3589_v44, 4 }
 0x10d   : > { %v1226_v15 = vsel %vm275_vm0, %v3583_v49, %v1225_v55  ;;  %v1180_v3 = vpack.i.b16 %v1179_v52, %v1178_v54  ;;  %v975_v60 = vpack.c.b16 %v974_v42, %v974_v42  ;;  %v1197_v37 = vrot.slane %v1196_v31, 4 }
 0x10e   : > { %v3656_v10 = vperm.slane %v1186_v53, %v3197_v2  ;;  %v1208_v14 = vperm.slane %v1200_v48, %v3225_v18  ;;  %v3662_v25 = vperm.slane %v1226_v15, %v3225_v18  ;;  %v1183_v49 = vpack.i.b16 %v3627_v46, %v3623_v33 }
 0x10f   : > { %637 = vrot.lane.b32.xlu2 %v636_v5, %s3143_s22  ;;  %v994_v5 = vunpack.c.l.b16 %v912_v24  ;;  %v942_v44 = vsel %vm275_vm0, 0, %v941_v41  ;;  %v3668_v17 = vperm.slane %v1180_v3, %v3197_v2  ;;  %v1177_v23 = vpack.i.b16 %v3637_v36, %v3633_v38 }
 0x110   : > { %v1275_v4 = vrot.slane %v3656_v10, 4  ;;  %v1198_v35 = vsel %vm275_vm0, %v1197_v37, %v1191_v19  ;;  %v1307_v22 = vunpack.c.l.b16 %v1208_v14  ;;  %v915_v1 = vrot.slane %v912_v24, 4 }
 0x111   : > { %951 = vrot.lane.b32.xlu0 %v950_v63, %s3143_s22  ;;  %v1293_v63 = vpack.c.b16 %v1292_v56, %v1292_v56  ;;  %v995_v20 = vpack.c.b16 %v994_v5, %v994_v5  ;;  %v1235_v13 = vrot.slane %v1230_v43, 4  ;;  %v1009_v26 = vunpack.c.l.b16 %v942_v44 }
 0x112   : > { %956 = vrot.lane.b32.xlu1 %v955_v8, %s3146_s25  ;;  %v940_v8 = vsel %vm275_vm0, 0, %v939_v50  ;;  %v1237_v34 = vrot.slane %v3662_v25, 4  ;;  %v1248_v28 = vperm.slane %v1183_v49, %v3197_v2  ;;  %v1276_v32 = vsel %vm275_vm0, %v1275_v4, %v3668_v17 }
 0x113   : > { %v989_v30 = vunpack.c.l.b16 %v940_v8  ;;  %v3681_v6 = vperm.slane %v1198_v35, %v3225_v18  ;;  %v1308_v19 = vpack.c.b16 %v1307_v22, %v1307_v22  ;;  %v1236_v58 = vsel %vm275_vm0, 0, %v1235_v13 }
 0x114   : > { %v1010_v43 = vpack.c.b16 %v1009_v26, %v1009_v26  ;;  %v1238_v47 = vsel %vm275_vm0, 0, %v1237_v34  ;;  %v1249_v24 = vrot.slane %v1248_v28, 4  ;;  %v1302_v54 = vunpack.c.l.b16 %v1236_v58 }
 0x115   : > { %v990_v39 = vpack.c.b16 %v989_v30, %v989_v30  ;;  %v1209_v31 = vrot.slane %v3681_v6, 4  ;;  %v1322_v52 = vunpack.c.l.b16 %v1238_v47  ;;  %v1211_v53 = vrot.slane %v1208_v14, 4 }
 0x116   : > { %v1303_v41 = vpack.c.b16 %v1302_v54, %v1302_v54  ;;  %v1277_v22 = vrot.slane %v3668_v17, 4  ;;  %v1312_v13 = vunpack.c.l.b16 %v3662_v25 }
 0x117   : > { %697 = vrot.lane.b32.xlu2 %v696_v29, %s3145_s24  ;;  %v1243_v29 = vperm.slane %v1177_v23, %v3197_v2  ;;  %v1210_v50 = vsel %vm275_vm0, 0, %v1209_v31  ;;  %v1323_v15 = vpack.c.b16 %v1322_v52, %v1322_v52  ;;  %v1212_v3 = vsel %vm275_vm0, 0, %v1211_v53 }
 0x118   : > { %v1317_v14 = vunpack.c.l.b16 %v1212_v3 }
 0x119   : > { %642 = vrot.lane.b32.xlu0 %v641_v27, %s3146_s25  ;;  %v916_v27 = vsel %vm275_vm0, 0, %v915_v1  ;;  %v1251_v45 = vrot.slane %v1243_v29, 4  ;;  %v1250_v56 = vsel %vm275_vm0, %v1249_v24, %v1243_v29 }
 0x11a   : > { %1001 = vrot.lane.b32.xlu1 %v1000_v21, %s3144_s23  ;;  %v1282_v21 = vperm.slane %v1276_v32, %v3225_v18  ;;  %v1004_v55 = vunpack.c.l.b16 %v916_v27  ;;  %v1318_v23 = vpack.c.b16 %v1317_v14, %v1317_v14  ;;  %v1313_v32 = vpack.c.b16 %v1312_v13, %v1312_v13 }
 0x11b   : > { %v1252_v5 = vsel %vm275_vm0, %v1248_v28, %v1251_v45  ;;  %v1278_v28 = vsel %vm275_vm0, %v3656_v10, %v1277_v22 }
 0x11c   : > { %v1287_v42 = vrot.slane %v1282_v21, 4  ;;  %v1005_v48 = vpack.c.b16 %v1004_v55, %v1004_v55  ;;  %v1260_v8 = vperm.slane %v1252_v5, %v3225_v18 }
 0x11e   : > { %v1288_v37 = vsel %vm275_vm0, 0, %v1287_v42  ;;  %v1263_v4 = vrot.slane %v1260_v8, 4  ;;  %v1342_v47 = vunpack.c.l.b16 %v1260_v8 }
 0x11f   : > { %976 = vrot.lane.b32.xlu2 %v975_v60, %s3145_s24  ;;  %v3697_v60 = vperm.slane %v1250_v56, %v3225_v18 }
 0x120   : > { %v1264_v1 = vsel %vm275_vm0, 0, %v1263_v4 }
 0x121   : > { %996 = vrot.lane.b32.xlu0 %v995_v20, %s3141_s20  ;;  %v1337_v20 = vunpack.c.l.b16 %v1288_v37  ;;  %v1261_v49 = vrot.slane %v3697_v60, 4  ;;  %v1352_v34 = vunpack.c.l.b16 %v1264_v1 }
 0x122   : > { %1294 = vrot.lane.b32.xlu1 %v1293_v63, %s3142_s21  ;;  %v1297_v63 = vunpack.c.l.b16 %v1210_v50 }
 0x123   : > { %v1338_v30 = vpack.c.b16 %v1337_v20, %v1337_v20  ;;  %v1262_v35 = vsel %vm275_vm0, 0, %v1261_v49  ;;  %v1353_v17 = vpack.c.b16 %v1352_v34, %v1352_v34 }
 0x124   : > { %v1298_v44 = vpack.c.b16 %v1297_v63, %v1297_v63  ;;  %v1332_v26 = vunpack.c.l.b16 %v1262_v35 }
 0x126   : > { %v1333_v29 = vpack.c.b16 %v1332_v26, %v1332_v26 }
 0x127   : > { %991 = vrot.lane.b32.xlu2 %v990_v39, %s3146_s25  ;;  %v1286_v39 = vperm.slane %v1278_v28, %v3225_v18 }
 0x129   : > { %1011 = vrot.lane.b32.xlu0 %v1010_v43, %s3145_s24  ;;  %v1347_v25 = vunpack.c.l.b16 %v1286_v39  ;;  %v1289_v24 = vrot.slane %v1286_v39, 4 }
 0x12a   : > { %1309 = vrot.lane.b32.xlu1 %v1308_v19, %s3141_s20  ;;  %v1327_v19 = vunpack.c.l.b16 %v1282_v21  ;;  %v1343_v21 = vpack.c.b16 %v1342_v47, %v1342_v47 }
 0x12b   : > { %v1348_v43 = vpack.c.b16 %v1347_v25, %v1347_v25  ;;  %v1290_v45 = vsel %vm275_vm0, 0, %v1289_v24 }
 0x12c   : > { %v1328_v58 = vpack.c.b16 %v1327_v19, %v1327_v19  ;;  %v1357_v55 = vunpack.c.l.b16 %v1290_v45 }
 0x12e   : > { %v1358_v53 = vpack.c.b16 %v1357_v55, %v1357_v55 }
 0x12f   : > { %1006 = vrot.lane.b32.xlu2 %v1005_v48, %s3147_s26 }
 0x131   : > { %1304 = vrot.lane.b32.xlu0 %v1303_v41, %s3146_s25  ;;  %v683_v27 = vpop.permute.xlu2 %682 }
 0x132   : > { %1324 = vrot.lane.b32.xlu1 %v1323_v15, %s3145_s24 }
 0x137   : > { %1299 = vrot.lane.b32.xlu2 %v1298_v44, %s3143_s22  ;;  %v3107_v44 = vld [vmem:[%s3195_s19 + $0x18] sm:$0xf] }
 0x139   : > { %1319 = vrot.lane.b32.xlu0 %v1318_v23, %s3147_s26 }
 0x13a   : > { %1339 = vrot.lane.b32.xlu1 %v1338_v30, %s3146_s25 }
 0x13f   : > { %1314 = vrot.lane.b32.xlu2 %v1313_v32, %s3144_s23 }
 0x141   : > { %1334 = vrot.lane.b32.xlu0 %v1333_v29, %s3143_s22  ;;  %v3719_v10 = vpop.permute.xlu1 %647  ;;  %v3109_v29 = vld [vmem:[%s3195_s19 + $0x24] sm:$0xf] }
 0x142   : > { %1354 = vrot.lane.b32.xlu1 %v1353_v17, %s3147_s26  ;;  %v3046_v39 = vrot.slane %v3109_v29, 9  ;;  %v3110_v17 = vld [vmem:[%s3195_s19 + $0x28] sm:$0xf] }
 0x143   : > { %v2020_v19 = vrot.slane %v3110_v17, 5  ;;  %v3114_v17 = vld [vmem:[%s3195_s19] sm:$0xf] }
 0x147   : > { %1329 = vrot.lane.b32.xlu2 %v1328_v58, %s3142_s21 }
 0x149   : > { %v3721_v31 = vpop.permute.xlu2 %961  ;;  %1349 = vrot.lane.b32.xlu0 %v1348_v43, %s3144_s23  ;;  %v3732_v52 = vpop.permute.xlu1 %632  ;;  %v2022_v43 = vrot.slane %v2020_v19, 4 }
 0x14a   : > { %1430 = vrot.lane.b32.xlu1 %v3633_v38, %s3148_s27  ;;  %v701_v45 = vsel %vm439_vm1, %v3517_v51, %v3732_v52 }
 0x14b   : > { %v688_v56 = vpop.permute.xlu0 %687 }
 0x14f   : > { %1344 = vrot.lane.b32.xlu2 %v1343_v21, %s3141_s20 }
 0x151   : > { %v3728_v54 = vpop.permute.xlu2 %652  ;;  %1428 = vrot.lane.b32.xlu0 %v3555_v11, %s3148_s27  ;;  %v693_v50 = vpop.permute.xlu1 %692 }
 0x152   : > { %1436 = vrot.lane.b32.xlu1 %v3532_v40, %s3148_s27 }
 0x157   : > { %1359 = vrot.lane.b32.xlu2 %v1358_v53, %s3145_s24 }
 0x159   : > { %v668_v42 = vpop.permute.xlu2 %667  ;;  %1434 = vrot.lane.b32.xlu0 %v3637_v36, %s3148_s27 }
 0x15a   : > { %1442 = vrot.lane.b32.xlu1 %v3627_v46, %s3148_s27 }
 0x15f   : > { %1432 = vrot.lane.b32.xlu2 %v3560_v7, %s3148_s27 }
 0x161   : > { %v947_v5 = vpop.permute.xlu2 %946  ;;  %1440 = vrot.lane.b32.xlu0 %v3537_v59, %s3148_s27 }
 0x162   : > { %1721 = vrot.lane.b32.xlu1 %v3537_v59, %s3149_s28  ;;  %v1015_v13 = vsel %vm439_vm1, %v3541_v62, %v947_v5  ;;  %v3809_v62 = vsel %vm3778_vm14, %v3046_v39, %v2020_v19  ;;  %v3043_v19 = vrot.slane %v3114_v17, 9 }
 0x163   : > { %v967_v48 = vpop.permute.xlu0 %966  ;;  %v2035_v21 = vshrl.u32 %v3809_v62, 16 }
 0x164   : > { %v3747_v41 = vpop.permute.xlu1 %971 }
 0x167   : > { %1438 = vrot.lane.b32.xlu2 %v3623_v33, %s3148_s27 }
 0x169   : > { %v638_v15 = vpop.permute.xlu2 %637  ;;  %1719 = vrot.lane.b32.xlu0 %v3623_v33, %s3149_s28 }
 0x16a   : > { %1711 = vrot.lane.b32.xlu1 %v3633_v38, %s3149_s28  ;;  %v716_v38 = vsel %vm439_vm1, %v3500_v16, %v668_v42  ;;  %v703_v53 = vsel %vm443_vm2, %v701_v45, %v638_v15 }
 0x16b   : > { %v3755_v3 = vpop.permute.xlu0 %981 }
 0x16c   : > { %v3757_v37 = vpop.permute.xlu1 %986 }
 0x16f   : > { %1717 = vrot.lane.b32.xlu2 %v3532_v40, %s3149_s28 }
 0x171   : > { %v698_v59 = vpop.permute.xlu2 %697  ;;  %1709 = vrot.lane.b32.xlu0 %v3555_v11, %s3149_s28 }
 0x173   : > { %v658_v63 = vpop.permute.xlu0 %657 }
 0x174   : > { %v3763_v8 = vpop.permute.xlu1 %662 }
 0x177   : > { %1723 = vrot.lane.b32.xlu2 %v3627_v46, %s3149_s28  ;;  %v3045_v46 = vrot.slane %v3107_v44, 9 }
 0x179   : > { %v977_v33 = vpop.permute.xlu2 %976  ;;  %1715 = vrot.lane.b32.xlu0 %v3637_v36, %s3149_s28  ;;  %v3783_v36 = vld [vmem:[%s3195_s19 + $0x1c] sm:$0xf] }
 0x17a   : > { %v2013_v23 = vrot.slane %v3783_v36, 5 }
 0x17b   : > { %v673_v40 = vpop.permute.xlu0 %672 }
 0x17c   : > { %v718_v14 = vsel %vm443_vm2, %v716_v38, %v673_v40  ;;  %v678_v20 = vpop.permute.xlu1 %677  ;;  %v3111_v38 = vld [vmem:[%s3195_s19 + $0x4] sm:$0xf]  ;;  %v2002_v40 = vrot.slane %v3606_v0, 5 }
 0x17d   : > { %v720_v11 = vsel %vm446_vm3, %v718_v14, %v678_v20  ;;  %v1999_v15 = vrot.slane %v3111_v38, 5  ;;  %v3112_v14 = vld [vmem:[%s3195_s19 + $0xc] sm:$0xf] }
 0x17e   : > { %v722_v49 = vsel %vm449_vm4, %v720_v11, %v683_v27  ;;  %v2023_v27 = vrot.slane %v3595_v57, 5  ;;  %v3044_v20 = vrot.slane %v3112_v14, 9  ;;  %v3113_v11 = vld [vmem:[%s3195_s19 + $0x10] sm:$0xf] }
 0x17f   : > { %v724_v4 = vsel %vm452_vm5, %v722_v49, %v688_v56  ;;  %1713 = vrot.lane.b32.xlu2 %v3560_v7, %s3149_s28  ;;  %v3792_v7 = vsel %vm3778_vm14, %v3045_v46, %v2013_v23  ;;  %v2006_v49 = vrot.slane %v3113_v11, 5  ;;  %v2001_v44 = vrot.slane %v1999_v15, 4 }
 0x180   : > { %v726_v30 = vsel %vm455_vm6, %v724_v4, %v693_v50  ;;  %2298 = vrot.lane.b32.xlu1 %v3792_v7, %s3148_s27  ;;  %v2034_v58 = vshrl.u32 %v3792_v7, 16  ;;  %v2033_v24 = vpack.i.b16 %v3809_v62, %v3792_v7 }
 0x181   : > { %v992_v35 = vpop.permute.xlu2 %991  ;;  %v728_v22 = vsel %vm458_vm7, %v726_v30, %v698_v59  ;;  %2302 = vrot.lane.b32.xlu0 %v3809_v62, %s3148_s27  ;;  %v3851_v0 = vsel %vm3778_vm14, %v3044_v20, %v2006_v49 }
 0x182   : > { %v738_v1 = vsel %vm735_vm8, %v728_v22, 0  ;;  %v3824_v55 = vpack.i.b16 %v2035_v21, %v2034_v58  ;;  %v2016_v22 = vrot.slane %v3592_v12, 5  ;;  %v2029_v58 = vshrl.u32 %v3851_v0, 16 }
 0x183   : > { %760 = vmatpush.bf16.msra.mxu1 %v738_v1  ;;  %v952_v26 = vpop.permute.xlu0 %951 }
 0x184   : > { %v1017_v34 = vsel %vm443_vm2, %v1015_v13, %v952_v26  ;;  %v957_v28 = vpop.permute.xlu1 %956 }
 0x185   : > { %v1019_v32 = vsel %vm446_vm3, %v1017_v34, %v957_v28 }
 0x186   : > { %v1021_v25 = vsel %vm449_vm4, %v1019_v32, %v3721_v31  ;;  %v3819_v31 = vsel %vm3778_vm14, %v2022_v43, %v2023_v27  ;;  %v3894_v43 = vsel %vm3778_vm14, %v3043_v19, %v1999_v15 }
 0x187   : > { %v1023_v47 = vsel %vm452_vm5, %v1021_v25, %v967_v48  ;;  %v2047_v1 = vshrl.u32 %v3819_v31, 16  ;;  %v2027_v21 = vpack.i.b16 %v3851_v0, %v3894_v43 }
 0x188   : > { %2304 = vrot.lane.b32.xlu1 %v3819_v31, %s3148_s27  ;;  %v1025_v56 = vsel %vm455_vm6, %v1023_v47, %v3747_v41  ;;  %v1030_v41 = vsel %vm439_vm1, %v3451_v61, %v3755_v3  ;;  %v3857_v3 = vsel %vm3778_vm14, %v2001_v44, %v2002_v40 }
 0x189   : > { %v1007_v57 = vpop.permute.xlu2 %1006  ;;  %v1027_v52 = vsel %vm458_vm7, %v1025_v56, %v977_v33  ;;  %v1032_v46 = vsel %vm443_vm2, %v1030_v41, %v3757_v37  ;;  %2292 = vrot.lane.b32.xlu0 %v3857_v3, %s3148_s27  ;;  %v2015_v37 = vrot.slane %v2013_v23, 4 }
 0x18b   : > { %v643_v42 = vpop.permute.xlu0 %642  ;;  %v3871_v13 = vsel %vm3778_vm14, %v2015_v37, %v2016_v22 }
 0x18c   : > { %v705_v50 = vsel %vm446_vm3, %v703_v53, %v643_v42  ;;  %v1002_v5 = vpop.permute.xlu1 %1001  ;;  %v2045_v26 = vpack.i.b16 %v3819_v31, %v3871_v13  ;;  %v2046_v34 = vshrl.u32 %v3871_v13, 16  ;;  %2300 = vrot.lane.b32.xlu2 %v3871_v13, %s3148_s27 }
 0x18d   : > { %v707_v48 = vsel %vm449_vm4, %v705_v50, %v3719_v10 }
 0x18e   : > { %v709_v51 = vsel %vm452_vm5, %v707_v48, %v3728_v54  ;;  %v3879_v23 = vpack.i.b16 %v2047_v1, %v2046_v34  ;;  %v2009_v48 = vrot.slane %v3609_v9, 5 }
 0x18f   : > { %v711_v59 = vsel %vm455_vm6, %v709_v51, %v658_v63  ;;  %v1048_v63 = vsel %vm735_vm8, %v1027_v52, 0 }
 0x190   : > { %v713_v10 = vsel %vm458_vm7, %v711_v59, %v3763_v8  ;;  %2294 = vrot.lane.b32.xlu1 %v3851_v0, %s3148_s27  ;;  %v1034_v8 = vsel %vm446_vm3, %v1032_v46, %v992_v35  ;;  %v2040_v59 = vshrl.u32 %v3857_v3, 16 }
 0x191   : > { %v736_v54 = vsel %vm735_vm8, %v713_v10, 0  ;;  %v1300_v33 = vpop.permute.xlu2 %1299  ;;  %2579 = vrot.lane.b32.xlu0 %v3792_v7, %s3149_s28 }
 0x192   : > { %747 = vmatpush.bf16.msra.mxu0 %v736_v54 }
 0x193   : > { %v997_v61 = vpop.permute.xlu0 %996 }
 0x194   : > { %v1295_v4 = vpop.permute.xlu1 %1294  ;;  %v1036_v30 = vsel %vm449_vm4, %v1034_v8, %v997_v61  ;;  %2290 = vrot.lane.b32.xlu2 %v3894_v43, %s3148_s27 }
 0x195   : > { %v1038_v35 = vsel %vm452_vm5, %v1036_v30, %v1002_v5  ;;  %v1363_v27 = vsel %vm439_vm1, %v3681_v6, %v1295_v4  ;;  %v2008_v5 = vrot.slane %v2006_v49, 4 }
 0x196   : > { %1059 = vmatpush.bf16.msrb.mxu0 %v1048_v63  ;;  %v1040_v28 = vsel %vm455_vm6, %v1038_v35, %v1007_v57  ;;  %v2028_v57 = vshrl.u32 %v3894_v43, 16  ;;  %v1365_v6 = vsel %vm443_vm2, %v1363_v27, %v1300_v33 }
 0x197   : > { %v3918_v40 = vsel %vm3778_vm14, %v2008_v5, %v2009_v48 }
 0x198   : > { %2581 = vrot.lane.b32.xlu1 %v3871_v13, %s3149_s28  ;;  %v3907_v42 = vpack.i.b16 %v2029_v58, %v2028_v57  ;;  %v2039_v9 = vpack.i.b16 %v3918_v40, %v3857_v3  ;;  %v2041_v20 = vshrl.u32 %v3918_v40, 16  ;;  %v4081_v13 = vperm.slane %v3879_v23, %v3197_v2 }
 0x199   : > { %v1315_v36 = vpop.permute.xlu2 %1314  ;;  %2585 = vrot.lane.b32.xlu0 %v3819_v31, %s3149_s28  ;;  %v2058_v31 = vperm.slane %v2033_v24, %v3197_v2 }
 0x19a   : > { %v3929_v10 = vpack.i.b16 %v2041_v20, %v2040_v59 }
 0x19b   : > { %v1012_v12 = vpop.permute.xlu0 %1011 }
 0x19c   : > { %v1310_v32 = vpop.permute.xlu1 %1309  ;;  %v1042_v29 = vsel %vm458_vm7, %v1040_v28, %v1012_v12  ;;  %2296 = vrot.lane.b32.xlu2 %v3918_v40, %s3148_s27 }
 0x19d   : > { %v1050_v39 = vsel %vm735_vm8, %v1042_v29, 0 }
 0x19e   : > { %1072 = vmatpush.bf16.msrb.mxu1 %v1050_v39 }
 0x1a0   : > { %2571 = vrot.lane.b32.xlu1 %v3894_v43, %s3149_s28 }
 0x1a1   : > { %v1330_v25 = vpop.permute.xlu2 %1329  ;;  %2575 = vrot.lane.b32.xlu0 %v3851_v0, %s3149_s28 }
 0x1a2   : > { %v1378_v16 = vsel %vm439_vm1, %v3697_v60, %v1330_v25 }
 0x1a3   : > { %v1305_v47 = vpop.permute.xlu0 %1304 }
 0x1a4   : > { %v1325_v45 = vpop.permute.xlu1 %1324  ;;  %v1367_v53 = vsel %vm446_vm3, %v1365_v6, %v1305_v47  ;;  %2583 = vrot.lane.b32.xlu2 %v3809_v62, %s3149_s28 }
 0x1a5   : > { %v1369_v56 = vsel %vm449_vm4, %v1367_v53, %v1310_v32 }
 0x1a6   : > { %v1371_v51 = vsel %vm452_vm5, %v1369_v56, %v1315_v36 }
 0x1a8   : > { %2577 = vrot.lane.b32.xlu1 %v3918_v40, %s3149_s28 }
 0x1a9   : > { %v1345_v50 = vpop.permute.xlu2 %1344 }
 0x1ab   : > { %v1320_v52 = vpop.permute.xlu0 %1319 }
 0x1ac   : > { %v1373_v38 = vsel %vm455_vm6, %v1371_v51, %v1320_v52  ;;  %v1340_v15 = vpop.permute.xlu1 %1339  ;;  %2573 = vrot.lane.b32.xlu2 %v3857_v3, %s3149_s28  ;;  %v2053_v3 = vperm.slane %v2027_v21, %v3197_v2 }
 0x1ad   : > { %v1375_v14 = vsel %vm458_vm7, %v1373_v38, %v1325_v45 }
 0x1ae   : > { %v1396_v41 = vsel %vm735_vm8, %v1375_v14, 0 }
 0x1af   : > { %1407 = vmatpush.bf16.msrb.mxu2 %v1396_v41 }
 0x1b1   : > { %v1360_v54 = vpop.permute.xlu2 %1359 }
 0x1b3   : > { %v1335_v11 = vpop.permute.xlu0 %1334 }
 0x1b4   : > { %v1355_v49 = vpop.permute.xlu1 %1354  ;;  %v1380_v33 = vsel %vm443_vm2, %v1378_v16, %v1335_v11 }
 0x1b5   : > { %v1382_v44 = vsel %vm446_vm3, %v1380_v33, %v1340_v15 }
 0x1b6   : > { %v1384_v63 = vsel %vm449_vm4, %v1382_v44, %v1345_v50 }
 0x1b9   : > { %v1433_v30 = vpop.permute.xlu2 %1432 }
 0x1ba   : > { %v1448_v25 = vshrl.u32 %v1433_v30, 16 }
 0x1bb   : > { %v1350_v46 = vpop.permute.xlu0 %1349 }
 0x1bc   : > { %v1386_v61 = vsel %vm452_vm5, %v1384_v63, %v1350_v46  ;;  %v1431_v8 = vpop.permute.xlu1 %1430 }
 0x1bd   : > { %v1388_v4 = vsel %vm455_vm6, %v1386_v61, %v1355_v49  ;;  %v1459_v32 = vshrl.u32 %v1431_v8, 16 }
 0x1be   : > { %v1390_v60 = vsel %vm458_vm7, %v1388_v4, %v1360_v54 }
 0x1bf   : > { %v1398_v37 = vsel %vm735_vm8, %v1390_v60, 0 }
 0x1c0   : > { %1420 = vmatpush.bf16.msrb.mxu3 %v1398_v37 }
 0x1c1   : > { %v1439_v35 = vpop.permute.xlu2 %1438 }
 0x1c2   : > { %v1465_v36 = vshrl.u32 %v1439_v35, 16 }
 0x1c3   : > { %v1429_v22 = vpop.permute.xlu0 %1428 }
 0x1c4   : > { %v1437_v1 = vpop.permute.xlu1 %1436  ;;  %v1447_v58 = vshrl.u32 %v1429_v22, 16  ;;  %v1446_v50 = vpack.i.b16 %v1433_v30, %v1429_v22 }
 0x1c5   : > { %v1453_v5 = vshrl.u32 %v1437_v1, 16 }
 0x1c6   : > { %v1449_v52 = vpack.i.b16 %v1448_v25, %v1447_v58  ;;  %v1472_v11 = vperm.slane %v1446_v50, %v3197_v2 }
 0x1c8   : > { %v1498_v44 = vperm.slane %v1449_v52, %v3197_v2 }
 0x1c9   : > { %v3953_v38 = vpop.permute.xlu2 %1717 }
 0x1ca   : > { %v1506_v52 = vrot.slane %v1498_v44, 4 }
 0x1cb   : > { %v1435_v34 = vpop.permute.xlu0 %1434 }
 0x1cc   : > { %v1460_v12 = vshrl.u32 %v1435_v34, 16  ;;  %v1443_v28 = vpop.permute.xlu1 %1442  ;;  %v1458_v47 = vpack.i.b16 %v1435_v34, %v1431_v8 }
 0x1cd   : > { %v1464_v29 = vpack.i.b16 %v1443_v28, %v1439_v35  ;;  %v1466_v39 = vshrl.u32 %v1443_v28, 16 }
 0x1ce   : > { %v1461_v17 = vpack.i.b16 %v1460_v12, %v1459_v32  ;;  %v1524_v59 = vperm.slane %v1458_v47, %v3197_v2 }
 0x1cf   : > { %v1467_v19 = vpack.i.b16 %v1466_v39, %v1465_v36  ;;  %v1529_v27 = vperm.slane %v1464_v29, %v3197_v2  ;;  %v1480_v29 = vrot.slane %v1472_v11, 4 }
 0x1d0   : > { %v3949_v6 = vperm.slane %v1461_v17, %v3197_v2  ;;  %v1532_v37 = vrot.slane %v1524_v59, 4 }
 0x1d1   : > { %v3946_v57 = vperm.slane %v1467_v19, %v3197_v2  ;;  %v1530_v45 = vrot.slane %v1529_v27, 4  ;;  %v1724_v34 = vpop.permute.xlu2 %1723 }
 0x1d2   : > { %v1533_v25 = vsel %vm275_vm0, %v1529_v27, %v1532_v37  ;;  %v1558_v27 = vrot.slane %v3949_v6, 4 }
 0x1d3   : > { %v1556_v53 = vrot.slane %v3946_v57, 4  ;;  %v1441_v56 = vpop.permute.xlu0 %1440  ;;  %v1531_v16 = vsel %vm275_vm0, %v1530_v45, %v1524_v59 }
 0x1d4   : > { %v1452_v48 = vpack.i.b16 %v1441_v56, %v1437_v1  ;;  %v1454_v51 = vshrl.u32 %v1441_v56, 16  ;;  %v3965_v8 = vperm.slane %v1531_v16, %v3225_v18  ;;  %v1722_v58 = vpop.permute.xlu1 %1721 }
 0x1d5   : > { %v1557_v15 = vsel %vm275_vm0, %v1556_v53, %v3949_v6  ;;  %v1735_v16 = vshrl.u32 %v1722_v58, 16  ;;  %v1559_v6 = vsel %vm275_vm0, %v3946_v57, %v1558_v27 }
 0x1d6   : > { %v1455_v14 = vpack.i.b16 %v1454_v51, %v1453_v5  ;;  %v1477_v20 = vperm.slane %v1452_v48, %v3197_v2  ;;  %v1563_v41 = vperm.slane %v1557_v15, %v3225_v18  ;;  %v1542_v35 = vrot.slane %v3965_v8, 4 }
 0x1d7   : > { %v1541_v51 = vperm.slane %v1533_v25, %v3225_v18  ;;  %v1567_v57 = vperm.slane %v1559_v6, %v3225_v18 }
 0x1d8   : > { %v1478_v49 = vrot.slane %v1477_v20, 4  ;;  %v1503_v54 = vperm.slane %v1455_v14, %v3197_v2  ;;  %v1608_v33 = vunpack.c.l.b16 %v1563_v41  ;;  %v1568_v32 = vrot.slane %v1563_v41, 4 }
 0x1d9   : > { %v1543_v53 = vsel %vm275_vm0, 0, %v1542_v35  ;;  %v1481_v56 = vsel %vm275_vm0, %v1477_v20, %v1480_v29  ;;  %v1733_v14 = vpack.i.b16 %v1722_v58, %v3953_v38  ;;  %v1734_v41 = vshrl.u32 %v3953_v38, 16 }
 0x1da   : > { %v1504_v63 = vrot.slane %v1503_v54, 4  ;;  %v1609_v46 = vpack.c.b16 %v1608_v33, %v1608_v33  ;;  %v1479_v61 = vsel %vm275_vm0, %v1478_v49, %v1472_v11  ;;  %v1569_v5 = vsel %vm275_vm0, 0, %v1568_v32 }
 0x1db   : > { %v3967_v4 = vpop.permute.xlu0 %1719  ;;  %v3970_v60 = vperm.slane %v1479_v61, %v3225_v18  ;;  %v1613_v59 = vunpack.c.l.b16 %v1543_v53  ;;  %v1489_v15 = vperm.slane %v1481_v56, %v3225_v18  ;;  %v1618_v20 = vunpack.c.l.b16 %v1569_v5 }
 0x1dc   : > { %1610 = vrot.lane.b32.xlu0 %v1609_v46, %s3142_s21  ;;  %v1505_v30 = vsel %vm275_vm0, %v1504_v63, %v1498_v44  ;;  %v1507_v11 = vsel %vm275_vm0, %v1503_v54, %v1506_v52  ;;  %v1623_v49 = vunpack.c.l.b16 %v1541_v51  ;;  %v1747_v33 = vshrl.u32 %v1724_v34, 16  ;;  %v1714_v63 = vpop.permute.xlu2 %1713  ;;  %v1712_v35 = vpop.permute.xlu1 %1711 }
 0x1dd   : > { %v1511_v22 = vperm.slane %v1505_v30, %v3225_v18  ;;  %v1490_v1 = vrot.slane %v3970_v60, 4  ;;  %v1614_v46 = vpack.c.b16 %v1613_v59, %v1613_v59  ;;  %v1492_v44 = vrot.slane %v1489_v15, 4 }
 0x1de   : > { %v1746_v61 = vshrl.u32 %v3967_v4, 16  ;;  %v3996_v30 = vperm.slane %v1733_v14, %v3197_v2  ;;  %v1619_v37 = vpack.c.b16 %v1618_v20, %v1618_v20  ;;  %v1736_v38 = vpack.i.b16 %v1735_v16, %v1734_v41 }
 0x1df   : > { %v1573_v36 = vunpack.c.l.b16 %v1511_v22  ;;  %v1491_v12 = vsel %vm275_vm0, 0, %v1490_v1  ;;  %v1516_v28 = vrot.slane %v1511_v22, 4  ;;  %v1515_v22 = vperm.slane %v1507_v11, %v3225_v18 }
 0x1e0   : > { %v1578_v39 = vunpack.c.l.b16 %v1491_v12  ;;  %v1745_v54 = vpack.i.b16 %v1724_v34, %v3967_v4  ;;  %v1588_v29 = vunpack.c.l.b16 %v1489_v15  ;;  %v4007_v4 = vperm.slane %v1736_v38, %v3197_v2 }
 0x1e1   : > { %v1574_v17 = vpack.c.b16 %v1573_v36, %v1573_v36  ;;  %v1517_v19 = vsel %vm275_vm0, 0, %v1516_v28  ;;  %v1624_v36 = vpack.c.b16 %v1623_v49, %v1623_v49  ;;  %v1729_v28 = vshrl.u32 %v1714_v63, 16 }
 0x1e2   : > { %v1579_v47 = vpack.c.b16 %v1578_v39, %v1578_v39  ;;  %v1583_v45 = vunpack.c.l.b16 %v1517_v19  ;;  %v1493_v39 = vsel %vm275_vm0, 0, %v1492_v44  ;;  %v1759_v19 = vrot.slane %v3996_v30, 4 }
 0x1e3   : > { %1575 = vrot.lane.b32.xlu2 %v1574_v17, %s3142_s21  ;;  %v1710_v50 = vpop.permute.xlu0 %1709  ;;  %v1748_v17 = vpack.i.b16 %v1747_v33, %v1746_v61  ;;  %v1593_v25 = vunpack.c.l.b16 %v1515_v22  ;;  %v1740_v34 = vshrl.u32 %v1712_v35, 16  ;;  %v1544_v58 = vrot.slane %v1541_v51, 4 }
 0x1e4   : > { %1580 = vrot.lane.b32.xlu1 %v1579_v47, %s3143_s22  ;;  %v1584_v48 = vpack.c.b16 %v1583_v45, %v1583_v45  ;;  %v1727_v1 = vpack.i.b16 %v1714_v63, %v1710_v50  ;;  %v1728_v12 = vshrl.u32 %v1710_v50, 16  ;;  %v4010_v47 = vperm.slane %v1745_v54, %v3197_v2 }
 0x1e5   : > { %v1598_v56 = vunpack.c.l.b16 %v1493_v39  ;;  %v1589_v5 = vpack.c.b16 %v1588_v29, %v1588_v29  ;;  %v4016_v52 = vperm.slane %v1748_v17, %v3197_v2  ;;  %v1594_v15 = vpack.c.b16 %v1593_v25, %v1593_v25 }
 0x1e6   : > { %1585 = vrot.lane.b32.xlu0 %v1584_v48, %s3146_s25  ;;  %v4013_v45 = vperm.slane %v1727_v1, %v3197_v2  ;;  %v1730_v50 = vpack.i.b16 %v1729_v28, %v1728_v12  ;;  %v1570_v48 = vrot.slane %v1567_v57, 4  ;;  %v1785_v51 = vrot.slane %v4007_v4, 4 }
 0x1e7   : > { %v1545_v14 = vsel %vm275_vm0, 0, %v1544_v58  ;;  %v1811_v20 = vrot.slane %v4010_v47, 4  ;;  %v1599_v16 = vpack.c.b16 %v1598_v56, %v1598_v56  ;;  %v1628_v49 = vunpack.c.l.b16 %v1567_v57 }
 0x1e8   : > { %v1760_v27 = vsel %vm275_vm0, %v1759_v19, %v4013_v45  ;;  %v1779_v11 = vperm.slane %v1730_v50, %v3197_v2  ;;  %v1571_v33 = vsel %vm275_vm0, 0, %v1570_v48  ;;  %v1633_v6 = vunpack.c.l.b16 %v1545_v14 }
 0x1e9   : > { %v4028_v63 = vperm.slane %v1760_v27, %v3225_v18  ;;  %v1518_v61 = vrot.slane %v1515_v22, 4  ;;  %v1638_v1 = vunpack.c.l.b16 %v1571_v33  ;;  %v4054_v58 = vperm.slane %v3824_v55, %v3197_v2 }
 0x1ea   : > { %v1634_v57 = vpack.c.b16 %v1633_v6, %v1633_v6  ;;  %v1761_v27 = vrot.slane %v4013_v45, 4  ;;  %v4067_v55 = vperm.slane %v2045_v26, %v3197_v2 }
 0x1eb   : > { %1615 = vrot.lane.b32.xlu2 %v1614_v46, %s3143_s22  ;;  %v1716_v32 = vpop.permute.xlu0 %1715  ;;  %v1837_v46 = vrot.slane %v4016_v52, 4  ;;  %v1519_v12 = vsel %vm275_vm0, 0, %v1518_v61  ;;  %v1639_v29 = vpack.c.b16 %v1638_v1, %v1638_v1  ;;  %v2059_v61 = vrot.slane %v2058_v31, 4 }
 0x1ec   : > { %1620 = vrot.lane.b32.xlu1 %v1619_v37, %s3146_s25  ;;  %v1741_v53 = vshrl.u32 %v1716_v32, 16  ;;  %v1739_v59 = vpack.i.b16 %v1716_v32, %v1712_v35  ;;  %v1786_v37 = vsel %vm275_vm0, %v1785_v51, %v1779_v11  ;;  %v1629_v35 = vpack.c.b16 %v1628_v49, %v1628_v49 }
 0x1ed   : > { %v1792_v28 = vperm.slane %v1786_v37, %v3225_v18  ;;  %v1603_v39 = vunpack.c.l.b16 %v1519_v12  ;;  %v2085_v51 = vrot.slane %v4054_v58, 4  ;;  %v1762_v26 = vsel %vm275_vm0, %v3996_v30, %v1761_v27 }
 0x1ee   : > { %1625 = vrot.lane.b32.xlu0 %v1624_v36, %s3141_s20  ;;  %v1742_v41 = vpack.i.b16 %v1741_v53, %v1740_v34  ;;  %v1805_v44 = vperm.slane %v1739_v59, %v3197_v2  ;;  %v1771_v36 = vrot.slane %v4028_v63, 4  ;;  %v1770_v30 = vperm.slane %v1762_v26, %v3225_v18 }
 0x1ef   : > { %v1854_v25 = vunpack.c.l.b16 %v1792_v28  ;;  %v1604_v56 = vpack.c.b16 %v1603_v39, %v1603_v39  ;;  %v2060_v1 = vsel %vm275_vm0, %v2059_v61, %v2053_v3 }
 0x1f0   : > { %v1812_v38 = vsel %vm275_vm0, %v1811_v20, %v1805_v44  ;;  %v4036_v54 = vperm.slane %v1742_v41, %v3197_v2  ;;  %v1772_v17 = vsel %vm275_vm0, 0, %v1771_v36  ;;  %v1813_v45 = vrot.slane %v1805_v44, 4 }
 0x1f1   : > { %v4045_v22 = vperm.slane %v1812_v38, %v3225_v18  ;;  %v1859_v53 = vunpack.c.l.b16 %v1772_v17  ;;  %v1855_v48 = vpack.c.b16 %v1854_v25, %v1854_v25  ;;  %v4092_v44 = vperm.slane %v3929_v10, %v3197_v2 }
 0x1f2   : > { %v1838_v32 = vsel %vm275_vm0, %v1837_v46, %v4036_v54  ;;  %v2105_v46 = vperm.slane %v2039_v9, %v3197_v2  ;;  %v1814_v6 = vsel %vm275_vm0, %v4010_v47, %v1813_v45  ;;  %v1839_v40 = vrot.slane %v4036_v54, 4  ;;  %v4106_v9 = vpop.permute.xlu2 %2300 }
 0x1f3   : > { %1590 = vrot.lane.b32.xlu2 %v1589_v5, %s3141_s20  ;;  %v1844_v19 = vperm.slane %v1838_v32, %v3225_v18  ;;  %v1823_v34 = vrot.slane %v4045_v22, 4  ;;  %v4058_v5 = vperm.slane %v3907_v42, %v3197_v2  ;;  %v1787_v42 = vrot.slane %v1779_v11, 4 }
 0x1f4   : > { %1595 = vrot.lane.b32.xlu1 %v1594_v15, %s3144_s23  ;;  %v1860_v15 = vpack.c.b16 %v1859_v53, %v1859_v53  ;;  %v2111_v11 = vrot.slane %v4067_v55, 4  ;;  %v2137_v10 = vrot.slane %v4081_v13, 4  ;;  %v1822_v38 = vperm.slane %v1814_v6, %v3225_v18 }
 0x1f5   : > { %v1849_v50 = vrot.slane %v1844_v19, 4  ;;  %v1824_v59 = vsel %vm275_vm0, 0, %v1823_v34  ;;  %v1889_v14 = vunpack.c.l.b16 %v1844_v19  ;;  %v2086_v49 = vsel %vm275_vm0, %v2085_v51, %v4058_v5 }
 0x1f6   : > { %1600 = vrot.lane.b32.xlu0 %v1599_v16, %s3147_s26  ;;  %v1894_v41 = vunpack.c.l.b16 %v1824_v59  ;;  %v1797_v16 = vrot.slane %v1792_v28, 4  ;;  %v1788_v62 = vsel %vm275_vm0, %v4007_v4, %v1787_v42  ;;  %v2138_v0 = vsel %vm275_vm0, %v2137_v10, %v4092_v44 }
 0x1f7   : > { %v1850_v20 = vsel %vm275_vm0, 0, %v1849_v50  ;;  %v1890_v7 = vpack.c.b16 %v1889_v14, %v1889_v14  ;;  %v1796_v37 = vperm.slane %v1788_v62, %v3225_v18  ;;  %v2112_v43 = vsel %vm275_vm0, %v2111_v11, %v2105_v46  ;;  %v4134_v14 = vpop.permute.xlu1 %2298 }
 0x1f8   : > { %v1899_v33 = vunpack.c.l.b16 %v1850_v20  ;;  %v1895_v24 = vpack.c.b16 %v1894_v41, %v1894_v41  ;;  %v1798_v23 = vsel %vm275_vm0, 0, %v1797_v16  ;;  %v1869_v21 = vunpack.c.l.b16 %v1770_v30 }
 0x1f9   : > { %v1864_v47 = vunpack.c.l.b16 %v1798_v23  ;;  %v1840_v54 = vsel %vm275_vm0, %v4016_v52, %v1839_v40  ;;  %v2061_v36 = vrot.slane %v2053_v3, 4  ;;  %v1825_v12 = vrot.slane %v1822_v38, 4 }
 0x1fa   : > { %v1900_v4 = vpack.c.b16 %v1899_v33, %v1899_v33  ;;  %v1870_v28 = vpack.c.b16 %v1869_v21, %v1869_v21  ;;  %v1848_v32 = vperm.slane %v1840_v54, %v3225_v18  ;;  %v1904_v39 = vunpack.c.l.b16 %v1822_v38  ;;  %v4122_v17 = vpop.permute.xlu2 %2290 }
 0x1fb   : > { %1630 = vrot.lane.b32.xlu2 %v1629_v35, %s3144_s23  ;;  %v1874_v35 = vunpack.c.l.b16 %v1796_v37  ;;  %v1826_v19 = vsel %vm275_vm0, 0, %v1825_v12  ;;  %v2062_v52 = vsel %vm275_vm0, %v2058_v31, %v2061_v36  ;;  %v1773_v34 = vrot.slane %v1770_v30, 4 }
 0x1fc   : > { %1635 = vrot.lane.b32.xlu1 %v1634_v57, %s3147_s26  ;;  %v1865_v57 = vpack.c.b16 %v1864_v47, %v1864_v47  ;;  %v1909_v25 = vunpack.c.l.b16 %v1848_v32  ;;  %v1799_v53 = vrot.slane %v1796_v37, 4  ;;  %v1914_v50 = vunpack.c.l.b16 %v1826_v19 }
 0x1fd   : > { %v1774_v59 = vsel %vm275_vm0, 0, %v1773_v34  ;;  %v4132_v42 = vperm.slane %v2112_v43, %v3225_v18  ;;  %v1851_v16 = vrot.slane %v1848_v32, 4  ;;  %v2139_v26 = vrot.slane %v4092_v44, 4 }
 0x1fe   : > { %1640 = vrot.lane.b32.xlu0 %v1639_v29, %s3145_s24  ;;  %v1875_v29 = vpack.c.b16 %v1874_v35, %v1874_v35  ;;  %v1910_v27 = vpack.c.b16 %v1909_v25, %v1909_v25  ;;  %v1800_v51 = vsel %vm275_vm0, 0, %v1799_v53  ;;  %v1915_v20 = vpack.c.b16 %v1914_v50, %v1914_v50 }
 0x1ff   : > { %v1879_v41 = vunpack.c.l.b16 %v1774_v59  ;;  %v2087_v11 = vrot.slane %v4058_v5, 4  ;;  %v2144_v62 = vperm.slane %v2138_v0, %v3225_v18  ;;  %v1852_v6 = vsel %vm275_vm0, 0, %v1851_v16 }
 0x200   : > { %v1919_v10 = vunpack.c.l.b16 %v1852_v6  ;;  %v2327_v25 = vshrl.u32 %v4106_v9, 16  ;;  %v2315_v34 = vshrl.u32 %v4134_v14, 16 }
 0x201   : > { %v2088_v23 = vsel %vm275_vm0, %v4054_v58, %v2087_v11  ;;  %v1880_v44 = vpack.c.b16 %v1879_v41, %v1879_v41  ;;  %v2189_v3 = vunpack.c.l.b16 %v2144_v62 }
 0x202   : > { %v4142_v33 = vpop.permute.xlu2 %2296  ;;  %v1920_v38 = vpack.c.b16 %v1919_v10, %v1919_v10  ;;  %v2096_v59 = vperm.slane %v2088_v23, %v3225_v18 }
 0x203   : > { %1605 = vrot.lane.b32.xlu2 %v1604_v56, %s3145_s24  ;;  %v2113_v56 = vrot.slane %v2105_v46, 4  ;;  %v2123_v46 = vrot.slane %v4132_v42, 4  ;;  %v2190_v37 = vpack.c.b16 %v2189_v3, %v2189_v3 }
 0x204   : > { %1856 = vrot.lane.b32.xlu1 %v1855_v48, %s3142_s21  ;;  %v1905_v48 = vpack.c.b16 %v1904_v39, %v1904_v39  ;;  %v2174_v10 = vunpack.c.l.b16 %v2096_v59 }
 0x205   : > { %v2114_v45 = vsel %vm275_vm0, %v4067_v55, %v2113_v56  ;;  %v4149_v55 = vperm.slane %v2060_v1, %v3225_v18  ;;  %v2124_v61 = vsel %vm275_vm0, 0, %v2123_v46  ;;  %v2070_v1 = vperm.slane %v2062_v52, %v3225_v18 }
 0x206   : > { %1861 = vrot.lane.b32.xlu0 %v1860_v15, %s3143_s22  ;;  %v2092_v15 = vperm.slane %v2086_v49, %v3225_v18  ;;  %v1884_v49 = vunpack.c.l.b16 %v1800_v51  ;;  %v2194_v58 = vunpack.c.l.b16 %v2124_v61  ;;  %v2122_v19 = vperm.slane %v2114_v45, %v3225_v18 }
 0x207   : > { %v2071_v40 = vrot.slane %v4149_v55, 4  ;;  %v2169_v12 = vunpack.c.l.b16 %v2070_v1  ;;  %v2073_v41 = vrot.slane %v2070_v1, 4  ;;  %v2099_v46 = vrot.slane %v2096_v59, 4 }
 0x208   : > { %v2154_v31 = vunpack.c.l.b16 %v2092_v15  ;;  %v1885_v30 = vpack.c.b16 %v1884_v49, %v1884_v49  ;;  %v2195_v54 = vpack.c.b16 %v2194_v58, %v2194_v58 }
 0x209   : > { %v2072_v47 = vsel %vm275_vm0, 0, %v2071_v40  ;;  %v2170_v56 = vpack.c.b16 %v2169_v12, %v2169_v12  ;;  %v2175_v12 = vpack.c.b16 %v2174_v10, %v2174_v10 }
 0x20a   : > { %v2155_v5 = vpack.c.b16 %v2154_v31, %v2154_v31  ;;  %v4164_v0 = vpop.permute.xlu2 %2583  ;;  %v2159_v35 = vunpack.c.l.b16 %v2072_v47 }
 0x20b   : > { %1891 = vrot.lane.b32.xlu2 %v1890_v7, %s3142_s21  ;;  %v4145_v7 = vpop.permute.xlu0 %2302 }
 0x20c   : > { %1896 = vrot.lane.b32.xlu1 %v1895_v24, %s3143_s22  ;;  %v2140_v24 = vsel %vm275_vm0, %v4081_v13, %v2139_v26  ;;  %v4160_v13 = vpop.permute.xlu1 %2304  ;;  %v2316_v53 = vshrl.u32 %v4145_v7, 16  ;;  %v2322_v26 = vshrl.u32 %v4142_v33, 16 }
 0x20d   : > { %v2328_v52 = vshrl.u32 %v4160_v13, 16  ;;  %v2148_v50 = vperm.slane %v2140_v24, %v3225_v18  ;;  %v2326_v3 = vpack.i.b16 %v4160_v13, %v4106_v9 }
 0x20e   : > { %1901 = vrot.lane.b32.xlu0 %v1900_v4, %s3146_s25  ;;  %v2097_v4 = vrot.slane %v2092_v15, 4  ;;  %v2314_v15 = vpack.i.b16 %v4145_v7, %v4134_v14  ;;  %v2317_v16 = vpack.i.b16 %v2316_v53, %v2315_v34  ;;  %v2309_v14 = vshrl.u32 %v4122_v17, 16 }
 0x20f   : > { %v2329_v45 = vpack.i.b16 %v2328_v52, %v2327_v25  ;;  %v2209_v49 = vunpack.c.l.b16 %v2148_v50 }
 0x210   : > { %v2098_v43 = vsel %vm275_vm0, 0, %v2097_v4  ;;  %v2100_v4 = vsel %vm275_vm0, 0, %v2099_v46 }
 0x211   : > { %v2164_v36 = vunpack.c.l.b16 %v2098_v43  ;;  %v4197_v23 = vperm.slane %v2329_v45, %v3197_v2  ;;  %v2210_v61 = vpack.c.b16 %v2209_v49, %v2209_v49 }
 0x213   : > { %1866 = vrot.lane.b32.xlu2 %v1865_v57, %s3146_s25  ;;  %v4167_v21 = vpop.permute.xlu0 %2292  ;;  %v2149_v57 = vrot.slane %v2144_v62, 4  ;;  %v4193_v62 = vperm.slane %v2314_v15, %v3197_v2 }
 0x214   : > { %1871 = vrot.lane.b32.xlu1 %v1870_v28, %s3141_s20  ;;  %v2160_v28 = vpack.c.b16 %v2159_v35, %v2159_v35  ;;  %v2295_v32 = vpop.permute.xlu1 %2294  ;;  %v2321_v31 = vshrl.u32 %v4167_v21, 16  ;;  %v2184_v35 = vunpack.c.l.b16 %v2100_v4 }
 0x215   : > { %v2150_v39 = vsel %vm275_vm0, 0, %v2149_v57  ;;  %v2310_v7 = vshrl.u32 %v2295_v32, 16  ;;  %v2340_v58 = vrot.slane %v4193_v62, 4 }
 0x216   : > { %1876 = vrot.lane.b32.xlu0 %v1875_v29, %s3144_s23  ;;  %v2165_v29 = vpack.c.b16 %v2164_v36, %v2164_v36  ;;  %v2323_v40 = vpack.i.b16 %v2322_v26, %v2321_v31  ;;  %v2391_v36 = vperm.slane %v2326_v3, %v3197_v2  ;;  %v2185_v34 = vpack.c.b16 %v2184_v35, %v2184_v35 }
 0x218   : > { %v4222_v57 = vperm.slane %v2323_v40, %v3197_v2 }
 0x21b   : > { %1906 = vrot.lane.b32.xlu2 %v1905_v48, %s3141_s20  ;;  %v4181_v48 = vpop.permute.xlu2 %2573  ;;  %v4186_v51 = vpop.permute.xlu0 %2579 }
 0x21c   : > { %1911 = vrot.lane.b32.xlu1 %v1910_v27, %s3144_s23  ;;  %v2199_v27 = vunpack.c.l.b16 %v2150_v39  ;;  %v4204_v6 = vpop.permute.xlu1 %2581 }
 0x21e   : > { %1916 = vrot.lane.b32.xlu0 %v1915_v20, %s3147_s26  ;;  %v2204_v20 = vunpack.c.l.b16 %v2122_v19  ;;  %v2200_v11 = vpack.c.b16 %v2199_v27, %v2199_v27 }
 0x220   : > { %v2205_v24 = vpack.c.b16 %v2204_v20, %v2204_v20 }
 0x223   : > { %1881 = vrot.lane.b32.xlu2 %v1880_v44, %s3147_s26  ;;  %v2074_v44 = vsel %vm275_vm0, 0, %v2073_v41  ;;  %v4217_v1 = vpop.permute.xlu0 %2585 }
 0x224   : > { %1886 = vrot.lane.b32.xlu1 %v1885_v30, %s3145_s24  ;;  %v4201_v30 = vperm.slane %v2317_v16, %v3197_v2  ;;  %v2179_v47 = vunpack.c.l.b16 %v2074_v44  ;;  %v4240_v59 = vpop.permute.xlu1 %2571 }
 0x226   : > { %2156 = vrot.lane.b32.xlu0 %v2155_v5, %s3142_s21  ;;  %v2308_v5 = vpack.i.b16 %v2295_v32, %v4122_v17  ;;  %v2418_v17 = vrot.slane %v4197_v23, 4  ;;  %v2366_v9 = vrot.slane %v4201_v30, 4 }
 0x228   : > { %v2334_v13 = vperm.slane %v2308_v5, %v3197_v2  ;;  %v2419_v25 = vsel %vm275_vm0, %v2418_v17, %v4222_v57 }
 0x22a   : > { %v2342_v10 = vrot.slane %v2334_v13, 4 }
 0x22b   : > { %1921 = vrot.lane.b32.xlu2 %v1920_v38, %s3145_s24  ;;  %v2125_v38 = vrot.slane %v2122_v19, 4  ;;  %v2320_v19 = vpack.i.b16 %v4142_v33, %v4167_v21  ;;  %v2425_v21 = vperm.slane %v2419_v25, %v3225_v18  ;;  %v4251_v31 = vpop.permute.xlu0 %2575  ;;  %v2597_v25 = vshrl.u32 %v4164_v0, 16 }
 0x22c   : > { %2191 = vrot.lane.b32.xlu1 %v2190_v37, %s3142_s21  ;;  %v2311_v37 = vpack.i.b16 %v2310_v7, %v2309_v14  ;;  %v4267_v4 = vpop.permute.xlu1 %2577  ;;  %v2343_v35 = vsel %vm275_vm0, %v4193_v62, %v2342_v10 }
 0x22d   : > { %v2126_v39 = vsel %vm275_vm0, 0, %v2125_v38  ;;  %v2386_v15 = vperm.slane %v2320_v19, %v3197_v2 }
 0x22e   : > { %2196 = vrot.lane.b32.xlu0 %v2195_v54, %s3143_s22  ;;  %v2151_v54 = vrot.slane %v2148_v50, 4  ;;  %v4226_v32 = vperm.slane %v2311_v37, %v3197_v2  ;;  %v2214_v27 = vunpack.c.l.b16 %v2126_v39 }
 0x22f   : > { %v2394_v5 = vrot.slane %v2386_v15, 4 }
 0x230   : > { %v2152_v52 = vsel %vm275_vm0, 0, %v2151_v54  ;;  %v2367_v53 = vsel %vm275_vm0, %v2366_v9, %v4226_v32  ;;  %v2215_v16 = vpack.c.b16 %v2214_v27, %v2214_v27 }
 0x231   : > { %v2219_v33 = vunpack.c.l.b16 %v2152_v52  ;;  %v2373_v45 = vperm.slane %v2367_v53, %v3225_v18  ;;  %v2395_v54 = vsel %vm275_vm0, %v2391_v36, %v2394_v5  ;;  %v2595_v53 = vpack.i.b16 %v4164_v0, %v4186_v51 }
 0x232   : > { %v2403_v19 = vperm.slane %v2395_v54, %v3225_v18  ;;  %v2591_v5 = vshrl.u32 %v4251_v31, 16 }
 0x233   : > { %2161 = vrot.lane.b32.xlu2 %v2160_v28, %s3143_s22  ;;  %v2341_v28 = vsel %vm275_vm0, %v2340_v58, %v2334_v13  ;;  %v2220_v26 = vpack.c.b16 %v2219_v33, %v2219_v33  ;;  %v2378_v46 = vrot.slane %v2373_v45, 4  ;;  %v2435_v3 = vunpack.c.l.b16 %v2373_v45 }
 0x234   : > { %2166 = vrot.lane.b32.xlu1 %v2165_v29, %s3146_s25  ;;  %v2180_v29 = vpack.c.b16 %v2179_v47, %v2179_v47  ;;  %v4237_v50 = vperm.slane %v2341_v28, %v3225_v18  ;;  %v2430_v47 = vrot.slane %v2425_v21, 4  ;;  %v2368_v28 = vrot.slane %v4226_v32, 4 }
 0x235   : > { %v2379_v40 = vsel %vm275_vm0, 0, %v2378_v46  ;;  %v2436_v9 = vpack.c.b16 %v2435_v3, %v2435_v3  ;;  %v2420_v32 = vrot.slane %v4222_v57, 4  ;;  %v4296_v57 = vperm.slane %v2595_v53, %v3197_v2 }
 0x236   : > { %2171 = vrot.lane.b32.xlu0 %v2170_v56, %s3141_s20  ;;  %v2392_v56 = vrot.slane %v2391_v36, 4  ;;  %v2352_v49 = vrot.slane %v4237_v50, 4  ;;  %v2445_v17 = vunpack.c.l.b16 %v2379_v40  ;;  %v2596_v36 = vshrl.u32 %v4186_v51, 16 }
 0x237   : > { %v2369_v33 = vsel %vm275_vm0, %v4201_v30, %v2368_v28  ;;  %v2607_v30 = vpack.i.b16 %v4217_v1, %v4204_v6  ;;  %v2406_v54 = vrot.slane %v2403_v19, 4 }
 0x238   : > { %v2393_v41 = vsel %vm275_vm0, %v2392_v56, %v2386_v15  ;;  %v2353_v7 = vsel %vm275_vm0, 0, %v2352_v49  ;;  %v2446_v39 = vpack.c.b16 %v2445_v17, %v2445_v17  ;;  %v2609_v15 = vshrl.u32 %v4217_v1, 16 }
 0x239   : > { %v4254_v14 = vperm.slane %v2393_v41, %v3225_v18  ;;  %v2440_v58 = vunpack.c.l.b16 %v2353_v7  ;;  %v2485_v41 = vunpack.c.l.b16 %v2403_v19  ;;  %v4299_v51 = vperm.slane %v2369_v33, %v3225_v18 }
 0x23a   : > { %v2590_v7 = vshrl.u32 %v4240_v59, 16 }
 0x23b   : > { %2201 = vrot.lane.b32.xlu2 %v2200_v11, %s3146_s25  ;;  %v2470_v11 = vunpack.c.l.b16 %v2425_v21  ;;  %v2404_v37 = vrot.slane %v4254_v14, 4  ;;  %v2608_v21 = vshrl.u32 %v4204_v6, 16  ;;  %v2621_v6 = vrot.slane %v4296_v57, 4 }
 0x23c   : > { %2206 = vrot.lane.b32.xlu1 %v2205_v24, %s3141_s20  ;;  %v3026_v24 = vld [vmem:[%s4575_s1 + $0x4] sm:$0xf] }
 0x23d   : > { %v4213_v43 = vpop.permute.xlu2 %1575  ;;  %v2471_v44 = vpack.c.b16 %v2470_v11, %v2470_v11  ;;  %3027 = vmatmul.msk.bf16.vlgmr.msra.gmra.mxu0 %vm731_vm15, %v3026_v24  ;;  %3028 = vmatmul.msk.bf16.vlgmr.msra.gmra.mxu1 %vm731_vm15, %v3026_v24  ;;  %v2405_v13 = vsel %vm275_vm0, 0, %v2404_v37  ;;  %v2421_v11 = vsel %vm275_vm0, %v4197_v23, %v2420_v32  ;;  %v2610_v46 = vpack.i.b16 %v2609_v15, %v2608_v21 }
 0x23e   : > { %2211 = vrot.lane.b32.xlu0 %v2210_v61, %s3144_s23  ;;  %v2475_v62 = vunpack.c.l.b16 %v2405_v13  ;;  %v2589_v24 = vpack.i.b16 %v4251_v31, %v4240_v59  ;;  %v2429_v10 = vperm.slane %v2421_v11, %v3225_v18  ;;  %v2455_v59 = vunpack.c.l.b16 %v4299_v51 }
 0x23f   : > { %v4321_v31 = vperm.slane %v2607_v30, %v3197_v2  ;;  %v1644_v17 = vsel %vm439_vm1, %v3970_v60, %v4213_v43  ;;  %v2601_v60 = vpack.i.b16 %v4267_v4, %v4181_v48  ;;  %v2407_v32 = vsel %vm275_vm0, 0, %v2406_v54 }
 0x240   : > { %v2476_v49 = vpack.c.b16 %v2475_v62, %v2475_v62  ;;  %v2456_v43 = vpack.c.b16 %v2455_v59, %v2455_v59  ;;  %v2490_v15 = vunpack.c.l.b16 %v2429_v10 }
 0x241   : > { %v2673_v53 = vrot.slane %v4321_v31, 4 }
 0x243   : > { %2176 = vrot.lane.b32.xlu2 %v2175_v12, %s3144_s23  ;;  %v2441_v12 = vpack.c.b16 %v2440_v58, %v2440_v58  ;;  %v2602_v58 = vshrl.u32 %v4181_v48, 16 }
 0x244   : > { %2181 = vrot.lane.b32.xlu1 %v2180_v29, %s3147_s26  ;;  %v2431_v29 = vsel %vm275_vm0, 0, %v2430_v47  ;;  %v2603_v47 = vshrl.u32 %v4267_v4, 16 }
 0x245   : > { %v4245_v20 = vpop.permute.xlu2 %1615  ;;  %v2480_v27 = vunpack.c.l.b16 %v2431_v29  ;;  %v2592_v29 = vpack.i.b16 %v2591_v5, %v2590_v7  ;;  %v2491_v5 = vpack.c.b16 %v2490_v15, %v2490_v15 }
 0x246   : > { %2186 = vrot.lane.b32.xlu0 %v2185_v34, %s3145_s24  ;;  %v2351_v34 = vperm.slane %v2343_v35, %v3225_v18  ;;  %v4331_v35 = vperm.slane %v2589_v24, %v3197_v2  ;;  %v2604_v62 = vpack.i.b16 %v2603_v47, %v2602_v58 }
 0x247   : > { %v2481_v0 = vpack.c.b16 %v2480_v27, %v2480_v27  ;;  %v4352_v33 = vperm.slane %v2592_v29, %v3197_v2 }
 0x248   : > { %v2450_v40 = vunpack.c.l.b16 %v2351_v34 }
 0x24b   : > { %2216 = vrot.lane.b32.xlu2 %v2215_v16, %s3147_s26  ;;  %v2598_v16 = vpack.i.b16 %v2597_v25, %v2596_v36  ;;  %v2432_v36 = vrot.slane %v2429_v10, 4  ;;  %v2622_v25 = vsel %vm275_vm0, %v2621_v6, %v4331_v35 }
 0x24c   : > { %2221 = vrot.lane.b32.xlu1 %v2220_v26, %s3145_s24  ;;  %v2354_v26 = vrot.slane %v2351_v34, 4  ;;  %v4349_v4 = vperm.slane %v2622_v25, %v3225_v18 }
 0x24d   : > { %v4263_v61 = vpop.permute.xlu2 %1590  ;;  %v4315_v1 = vperm.slane %v2598_v16, %v3197_v2 }
 0x24e   : > { %2472 = vrot.lane.b32.xlu0 %v2471_v44, %s3142_s21  ;;  %v4271_v38 = vpop.permute.xlu0 %1610  ;;  %v2486_v44 = vpack.c.b16 %v2485_v41, %v2485_v41  ;;  %v2355_v23 = vsel %vm275_vm0, 0, %v2354_v26  ;;  %v4358_v41 = vperm.slane %v2601_v60, %v3197_v2 }
 0x24f   : > { %v2460_v28 = vunpack.c.l.b16 %v2355_v23  ;;  %v2647_v19 = vrot.slane %v4315_v1, 4  ;;  %v1659_v27 = vsel %vm439_vm1, %v3965_v8, %v4271_v38  ;;  %v2495_v38 = vunpack.c.l.b16 %v2407_v32 }
 0x250   : > { %v1661_v11 = vsel %vm443_vm2, %v1659_v27, %v4245_v20  ;;  %v2623_v32 = vrot.slane %v4331_v35, 4  ;;  %v2649_v27 = vrot.slane %v4352_v33, 4 }
 0x251   : > { %v2461_v48 = vpack.c.b16 %v2460_v28, %v2460_v28  ;;  %v2648_v26 = vsel %vm275_vm0, %v2647_v19, %v4352_v33  ;;  %v2496_v20 = vpack.c.b16 %v2495_v38, %v2495_v38 }
 0x252   : > { %v2654_v10 = vperm.slane %v2648_v26, %v3225_v18 }
 0x253   : > { %2437 = vrot.lane.b32.xlu2 %v2436_v9, %s3142_s21  ;;  %v4328_v9 = vperm.slane %v2610_v46, %v3197_v2  ;;  %v2674_v46 = vsel %vm275_vm0, %v2673_v53, %v4358_v41  ;;  %v476_v53 = vld [vmem:[%s4575_s1] sm:$0xf] }
 0x254   : > { %2442 = vrot.lane.b32.xlu1 %v2441_v12, %s3143_s22  ;;  %v4383_v6 = vperm.slane %v2674_v46, %v3225_v18  ;;  %3030 = vmatmul.msk.bf16.vlgmr.msra.gmra.mxu3 %vm731_vm15, %v476_v53  ;;  %v2659_v38 = vrot.slane %v2654_v10, 4 }
 0x255   : > { %v4284_v52 = vpop.permute.xlu2 %1630  ;;  %3029 = vmatmul.msk.bf16.vlgmr.msra.gmra.mxu2 %vm731_vm15, %v476_v53 }
 0x256   : > { %v1581_v56 = vpop.permute.xlu1 %1580  ;;  %2447 = vrot.lane.b32.xlu0 %v2446_v39, %s3146_s25  ;;  %v2451_v39 = vpack.c.b16 %v2450_v40, %v2450_v40 }
 0x257   : > { %v1646_v12 = vsel %vm443_vm2, %v1644_v17, %v1581_v56  ;;  %v2699_v56 = vrot.slane %v4328_v9, 4 }
 0x258   : > { %v1586_v45 = vpop.permute.xlu0 %1585 }
 0x259   : > { %v1648_v34 = vsel %vm446_vm3, %v1646_v12, %v1586_v45  ;;  %v2433_v45 = vsel %vm275_vm0, 0, %v2432_v36 }
 0x25a   : > { %v1650_v8 = vsel %vm449_vm4, %v1648_v34, %v4263_v61  ;;  %v2500_v24 = vunpack.c.l.b16 %v2433_v45  ;;  %v2675_v45 = vrot.slane %v4358_v41, 4  ;;  %v2660_v41 = vsel %vm275_vm0, 0, %v2659_v38 }
 0x25b   : > { %2477 = vrot.lane.b32.xlu2 %v2476_v49, %s3143_s22  ;;  %v2380_v49 = vrot.slane %v4299_v51, 4 }
 0x25c   : > { %2482 = vrot.lane.b32.xlu1 %v2481_v0, %s3146_s25  ;;  %v4367_v0 = vperm.slane %v2604_v62, %v3197_v2  ;;  %v2633_v2 = vrot.slane %v4349_v4, 4  ;;  %v2501_v59 = vpack.c.b16 %v2500_v24, %v2500_v24  ;;  %v2676_v46 = vsel %vm275_vm0, %v4321_v31, %v2675_v45 }
 0x25d   : > { %v1606_v3 = vpop.permute.xlu2 %1605  ;;  %v2381_v23 = vsel %vm275_vm0, 0, %v2380_v49  ;;  %v2624_v49 = vsel %vm275_vm0, %v4296_v57, %v2623_v32 }
 0x25e   : > { %v1621_v37 = vpop.permute.xlu1 %1620  ;;  %2487 = vrot.lane.b32.xlu0 %v2486_v44, %s3141_s20  ;;  %v2700_v51 = vsel %vm275_vm0, %v2699_v56, %v4367_v0  ;;  %v2634_v17 = vsel %vm275_vm0, 0, %v2633_v2  ;;  %v2701_v24 = vrot.slane %v4367_v0, 4 }
 0x25f   : > { %v1663_v61 = vsel %vm446_vm3, %v1661_v11, %v1621_v37  ;;  %v2706_v54 = vperm.slane %v2700_v51, %v3225_v18  ;;  %v2721_v25 = vunpack.c.l.b16 %v2634_v17 }
 0x260   : > { %v1626_v13 = vpop.permute.xlu0 %1625 }
 0x261   : > { %v1665_v58 = vsel %vm449_vm4, %v1663_v61, %v1626_v13  ;;  %v2716_v13 = vunpack.c.l.b16 %v2654_v10  ;;  %v2711_v19 = vrot.slane %v2706_v54, 4  ;;  %v2722_v56 = vpack.c.b16 %v2721_v25, %v2721_v25 }
 0x262   : > { %v1667_v28 = vsel %vm452_vm5, %v1665_v58, %v4284_v52  ;;  %v2751_v15 = vunpack.c.l.b16 %v2706_v54 }
 0x263   : > { %2452 = vrot.lane.b32.xlu2 %v2451_v39, %s3141_s20  ;;  %v2685_v39 = vrot.slane %v4383_v6, 4  ;;  %v2717_v34 = vpack.c.b16 %v2716_v13, %v2716_v13  ;;  %v2712_v35 = vsel %vm275_vm0, 0, %v2711_v19 }
 0x264   : > { %2457 = vrot.lane.b32.xlu1 %v2456_v43, %s3144_s23  ;;  %v2761_v11 = vunpack.c.l.b16 %v2712_v35  ;;  %v2752_v33 = vpack.c.b16 %v2751_v15, %v2751_v15 }
 0x265   : > { %v4354_v21 = vpop.permute.xlu2 %1891  ;;  %v2686_v52 = vsel %vm275_vm0, 0, %v2685_v39 }
 0x266   : > { %v1596_v16 = vpop.permute.xlu1 %1595  ;;  %2462 = vrot.lane.b32.xlu0 %v2461_v48, %s3147_s26  ;;  %v2762_v57 = vpack.c.b16 %v2761_v11, %v2761_v11  ;;  %v1940_v13 = vsel %vm439_vm1, %v4045_v22, %v4354_v21 }
 0x267   : > { %v1652_v30 = vsel %vm452_vm5, %v1650_v8, %v1596_v16  ;;  %v2756_v8 = vunpack.c.l.b16 %v2686_v52 }
 0x268   : > { %v1601_v7 = vpop.permute.xlu0 %1600 }
 0x269   : > { %v1654_v44 = vsel %vm455_vm6, %v1652_v30, %v1601_v7  ;;  %v2650_v30 = vsel %vm275_vm0, %v4315_v1, %v2649_v27  ;;  %v2757_v61 = vpack.c.b16 %v2756_v8, %v2756_v8  ;;  %v2632_v7 = vperm.slane %v2624_v49, %v3225_v18 }
 0x26a   : > { %v1656_v40 = vsel %vm458_vm7, %v1654_v44, %v1606_v3  ;;  %v2465_v3 = vunpack.c.l.b16 %v2381_v23  ;;  %v2658_v51 = vperm.slane %v2650_v30, %v3225_v18  ;;  %v2726_v1 = vunpack.c.l.b16 %v2660_v41 }
 0x26b   : > { %2492 = vrot.lane.b32.xlu2 %v2491_v5, %s3144_s23  ;;  %v1677_v37 = vsel %vm735_vm8, %v1656_v40, 0  ;;  %v2684_v5 = vperm.slane %v2676_v46, %v3225_v18  ;;  %v2731_v2 = vunpack.c.l.b16 %v2632_v7  ;;  %v2702_v40 = vsel %vm275_vm0, %v4328_v9, %v2701_v24 }
 0x26c   : > { %2497 = vrot.lane.b32.xlu1 %v2496_v20, %s3147_s26  ;;  %1688 = vmatpush.bf16.msra.mxu0 %v1677_v37  ;;  %v2466_v43 = vpack.c.b16 %v2465_v3, %v2465_v3  ;;  %v2736_v20 = vunpack.c.l.b16 %v2658_v51  ;;  %v2727_v23 = vpack.c.b16 %v2726_v1, %v2726_v1  ;;  %v2710_v37 = vperm.slane %v2702_v40, %v3225_v18 }
 0x26d   : > { %v4389_v47 = vpop.permute.xlu2 %1866  ;;  %v2687_v10 = vrot.slane %v2684_v5, 4  ;;  %v2732_v58 = vpack.c.b16 %v2731_v2, %v2731_v2  ;;  %v2766_v17 = vunpack.c.l.b16 %v2684_v5 }
 0x26e   : > { %v1636_v12 = vpop.permute.xlu1 %1635  ;;  %2502 = vrot.lane.b32.xlu0 %v2501_v59, %s3145_s24  ;;  %v2737_v59 = vpack.c.b16 %v2736_v20, %v2736_v20  ;;  %v2771_v9 = vunpack.c.l.b16 %v2710_v37  ;;  %v2713_v27 = vrot.slane %v2710_v37, 4  ;;  %v3040_v37 = vld [vmem:[%s4575_s1 + $0x14] sm:$0xf] }
 0x26f   : > { %v1669_v29 = vsel %vm455_vm6, %v1667_v28, %v1636_v12  ;;  %v2688_v54 = vsel %vm275_vm0, 0, %v2687_v10  ;;  %v2635_v28 = vrot.slane %v2632_v7, 4 }
 0x270   : > { %v1641_v36 = vpop.permute.xlu0 %1640 }
 0x271   : > { %v1671_v60 = vsel %vm458_vm7, %v1669_v29, %v1641_v36  ;;  %v2661_v29 = vrot.slane %v2658_v51, 4  ;;  %v2776_v36 = vunpack.c.l.b16 %v2688_v54  ;;  %v2636_v19 = vsel %vm275_vm0, 0, %v2635_v28  ;;  %v3031_v51 = vld [vmem:[%s4575_s1 + $0x8] sm:$0xf] }
 0x272   : > { %v1679_v62 = vsel %vm735_vm8, %v1671_v60, 0  ;;  %v2767_v60 = vpack.c.b16 %v2766_v17, %v2766_v17  ;;  %v2741_v52 = vunpack.c.l.b16 %v2636_v19  ;;  %3032 = vmatmul.msk.bf16.vlgmr.msrb.gmra.mxu0 %vm731_vm15, %v3031_v51  ;;  %3033 = vmatmul.msk.bf16.vlgmr.msrb.gmra.mxu1 %vm731_vm15, %v3031_v51 }
 0x273   : > { %2467 = vrot.lane.b32.xlu2 %v2466_v43, %s3145_s24  ;;  %1701 = vmatpush.bf16.msra.mxu1 %v1679_v62  ;;  %v2772_v43 = vpack.c.b16 %v2771_v9, %v2771_v9  ;;  %v2777_v21 = vpack.c.b16 %v2776_v36, %v2776_v36 }
 0x274   : > { %2718 = vrot.lane.b32.xlu1 %v2717_v34, %s3142_s21  ;;  %v2662_v34 = vsel %vm275_vm0, 0, %v2661_v29  ;;  %v2742_v38 = vpack.c.b16 %v2741_v52, %v2741_v52 }
 0x275   : > { %v4409_v48 = vpop.permute.xlu2 %1906 }
 0x276   : > { %v1857_v16 = vpop.permute.xlu1 %1856  ;;  %2723 = vrot.lane.b32.xlu0 %v2722_v56, %s3143_s22  ;;  %v2746_v56 = vunpack.c.l.b16 %v2662_v34 }
 0x277   : > { %v1925_v25 = vsel %vm439_vm1, %v4028_v63, %v1857_v16 }
 0x278   : > { %v1862_v26 = vpop.permute.xlu0 %1861 }
 0x279   : > { %v1927_v22 = vsel %vm443_vm2, %v1925_v25, %v1862_v26  ;;  %v2747_v26 = vpack.c.b16 %v2746_v56, %v2746_v56 }
 0x27a   : > { %v1929_v15 = vsel %vm446_vm3, %v1927_v22, %v4389_v47 }
 0x27b   : > { %2753 = vrot.lane.b32.xlu2 %v2752_v33, %s3142_s21 }
 0x27c   : > { %2758 = vrot.lane.b32.xlu1 %v2757_v61, %s3143_s22 }
 0x27d   : > { %v4427_v44 = vpop.permute.xlu2 %1881 }
 0x27e   : > { %v1897_v31 = vpop.permute.xlu1 %1896  ;;  %2763 = vrot.lane.b32.xlu0 %v2762_v57, %s3146_s25 }
 0x27f   : > { %v1942_v18 = vsel %vm443_vm2, %v1940_v13, %v1897_v31  ;;  %v3034_v31 = vld [vmem:[%s4575_s1 + $0xc] sm:$0xf] }
 0x280   : > { %v1902_v0 = vpop.permute.xlu0 %1901  ;;  %3035 = vmatmul.msk.bf16.vlgmr.msrb.gmra.mxu2 %vm731_vm15, %v3034_v31  ;;  %3036 = vmatmul.msk.bf16.vlgmr.msrb.gmra.mxu3 %vm731_vm15, %v3034_v31 }
 0x281   : > { %v1944_v62 = vsel %vm446_vm3, %v1942_v18, %v1902_v0 }
 0x282   : > { %v1946_v63 = vsel %vm449_vm4, %v1944_v62, %v4409_v48  ;;  %v2714_v48 = vsel %vm275_vm0, 0, %v2713_v27 }
 0x283   : > { %2728 = vrot.lane.b32.xlu2 %v2727_v23, %s3146_s25  ;;  %v2781_v30 = vunpack.c.l.b16 %v2714_v48 }
 0x284   : > { %2733 = vrot.lane.b32.xlu1 %v2732_v58, %s3141_s20 }
 0x285   : > { %v1922_v3 = vpop.permute.xlu2 %1921  ;;  %v2782_v57 = vpack.c.b16 %v2781_v30, %v2781_v30 }
 0x286   : > { %v1872_v12 = vpop.permute.xlu1 %1871  ;;  %2738 = vrot.lane.b32.xlu0 %v2737_v59, %s3144_s23 }
 0x287   : > { %v1931_v45 = vsel %vm449_vm4, %v1929_v15, %v1872_v12 }
 0x288   : > { %v1877_v39 = vpop.permute.xlu0 %1876 }
 0x289   : > { %v1933_v11 = vsel %vm452_vm5, %v1931_v45, %v1877_v39 }
 0x28a   : > { %v1935_v61 = vsel %vm455_vm6, %v1933_v11, %v4427_v44 }
 0x28b   : > { %2768 = vrot.lane.b32.xlu2 %v2767_v60, %s3141_s20 }
 0x28c   : > { %2773 = vrot.lane.b32.xlu1 %v2772_v43, %s3144_s23 }
 0x28d   : > { %v2162_v32 = vpop.permute.xlu2 %2161 }
 0x28e   : > { %v1912_v53 = vpop.permute.xlu1 %1911  ;;  %2778 = vrot.lane.b32.xlu0 %v2777_v21, %s3147_s26 }
 0x28f   : > { %v1948_v35 = vsel %vm452_vm5, %v1946_v63, %v1912_v53 }
 0x290   : > { %v1917_v16 = vpop.permute.xlu0 %1916 }
 0x291   : > { %v1950_v8 = vsel %vm455_vm6, %v1948_v35, %v1917_v16 }
 0x292   : > { %v1952_v49 = vsel %vm458_vm7, %v1950_v8, %v1922_v3 }
 0x293   : > { %2743 = vrot.lane.b32.xlu2 %v2742_v38, %s3147_s26  ;;  %v1960_v33 = vsel %vm735_vm8, %v1952_v49, 0  ;;  %s3060_s26 = sshll.u32 %s4587_s12, 3 }
 0x294   : > { %2748 = vrot.lane.b32.xlu1 %v2747_v26, %s3145_s24  ;;  %1982 = vmatpush.bf16.msra.mxu3 %v1960_v33  ;;  %s226_s29 = scalar_lea.vmem %s4577_s3, %s3060_s26 }
 0x295   : > { %v2202_v47 = vpop.permute.xlu2 %2201 }
 0x296   : > { %v1887_v46 = vpop.permute.xlu1 %1886 }
 0x297   : > { %v1937_v41 = vsel %vm458_vm7, %v1935_v61, %v1887_v46  ;;  %3042 = vmatmul.msk.bf16.vlgmr.msra.gmra.mxu3 %vm731_vm15, %v3040_v37 }
 0x298   : > { %v1958_v7 = vsel %vm735_vm8, %v1937_v41, 0  ;;  %v2157_v24 = vpop.permute.xlu0 %2156 }
 0x299   : > { %1969 = vmatpush.bf16.msra.mxu2 %v1958_v7  ;;  %v2225_v20 = vsel %vm439_vm1, %v4149_v55, %v2157_v24  ;;  %v3037_v55 = vld [vmem:[%s4575_s1 + $0x10] sm:$0xf] }
 0x29a   : > { %v2227_v58 = vsel %vm443_vm2, %v2225_v20, %v2162_v32  ;;  %3038 = vmatmul.msk.bf16.vlgmr.msra.gmra.mxu0 %vm731_vm15, %v3037_v55  ;;  %3039 = vmatmul.msk.bf16.vlgmr.msra.gmra.mxu1 %vm731_vm15, %v3037_v55  ;;  %v3047_v32 = vld [vmem:[%s4575_s1 + $0x18] sm:$0xf] }
 0x29b   : > { %2783 = vrot.lane.b32.xlu2 %v2782_v57, %s3145_s24 }
 0x29c   : > { %3041 = vmatmul.msk.bf16.vlgmr.msra.gmra.mxu2 %vm731_vm15, %v3040_v37 }
 0x29d   : > { %v2177_v1 = vpop.permute.xlu2 %2176 }
 0x29e   : > { %v2192_v5 = vpop.permute.xlu1 %2191 }
 0x29f   : > { %v2240_v17 = vsel %vm439_vm1, %v4132_v42, %v2192_v5 }
 0x2a0   : > { %v2197_v44 = vpop.permute.xlu0 %2196 }
 0x2a1   : > { %v2242_v12 = vsel %vm443_vm2, %v2240_v17, %v2197_v44 }
 0x2a2   : > { %v2244_v13 = vsel %vm446_vm3, %v2242_v12, %v2202_v47 }
 0x2a5   : > { %v2217_v2 = vpop.permute.xlu2 %2216 }
 0x2a6   : > { %v2167_v40 = vpop.permute.xlu1 %2166 }
 0x2a7   : > { %v2229_v59 = vsel %vm446_vm3, %v2227_v58, %v2167_v40 }
 0x2a8   : > { %v2172_v0 = vpop.permute.xlu0 %2171 }
 0x2a9   : > { %v2231_v54 = vsel %vm449_vm4, %v2229_v59, %v2172_v0 }
 0x2aa   : > { %v2233_v42 = vsel %vm452_vm5, %v2231_v54, %v2177_v1 }
 0x2ad   : > { %v2438_v23 = vpop.permute.xlu2 %2437 }
 0x2ae   : > { %v2207_v10 = vpop.permute.xlu1 %2206  ;;  %v2506_v27 = vsel %vm439_vm1, %v4237_v50, %v2438_v23  ;;  %v3150_v23 = vmov 0  }
 0x2af   : > { %v2246_v18 = vsel %vm449_vm4, %v2244_v13, %v2207_v10  ;;  %3098 = vset.pattern.permute.xlu0 %v3150_v23 }
 0x2b0   : > { %v2212_v3 = vpop.permute.xlu0 %2211 }
 0x2b1   : > { %v2248_v60 = vsel %vm452_vm5, %v2246_v18, %v2212_v3 }
 0x2b2   : > { %v2250_v62 = vsel %vm455_vm6, %v2248_v60, %v2217_v2  ;;  %v2852_v2 = vld [vmem:[%s4576_s2] sm:$0xff] }
 0x2b3   : > { %2855 = vperm.xlu0 %3098, %v2852_v2  }
 0x2b5   : > { %v2478_v9 = vpop.permute.xlu2 %2477 }
 0x2b6   : > { %v2182_v28 = vpop.permute.xlu1 %2181 }
 0x2b7   : > { %v2235_v29 = vsel %vm455_vm6, %v2233_v42, %v2182_v28 }
 0x2b8   : > { %v2187_v39 = vpop.permute.xlu0 %2186 }
 0x2b9   : > { %v2237_v36 = vsel %vm458_vm7, %v2235_v29, %v2187_v39 }
 0x2ba   : > { %v2258_v25 = vsel %vm735_vm8, %v2237_v36, 0  ;;  %v749_v40 = vpop.f32.mrf.mxu0  ;;  %v762_v0 = vpop.f32.mrf.mxu1 }
 0x2bb   : > { %2269 = vmatpush.bf16.msrb.mxu0 %v2258_v25 }
 0x2bd   : > { %v2453_v43 = vpop.permute.xlu2 %2452 }
 0x2be   : > { %v2222_v19 = vpop.permute.xlu1 %2221  ;;  %3048 = vmatmul.msk.bf16.vlgmr.msrb.gmra.mxu0 %vm731_vm15, %v3047_v32 }
 0x2bf   : > { %v2252_v34 = vsel %vm458_vm7, %v2250_v62, %v2222_v19 }
 0x2c0   : > { %v2260_v22 = vsel %vm735_vm8, %v2252_v34, 0  ;;  %v2473_v21 = vpop.permute.xlu0 %2472 }
 0x2c1   : > { %2282 = vmatpush.bf16.msrb.mxu1 %v2260_v22  ;;  %v2521_v8 = vsel %vm439_vm1, %v4254_v14, %v2473_v21  ;;  %v3050_v14 = vld [vmem:[%s4575_s1 + $0x1c] sm:$0xf] }
 0x2c2   : > { %v2523_v26 = vsel %vm443_vm2, %v2521_v8, %v2478_v9  ;;  %v751_v37 = vpop.f32.mrf.mxu0  ;;  %v764_v59 = vpop.f32.mrf.mxu1 }
 0x2c4   : > { %3049 = vmatmul.msk.bf16.vlgmr.msrb.gmra.mxu1 %vm731_vm15, %v3047_v32 }
 0x2c5   : > { %v2493_v52 = vpop.permute.xlu2 %2492 }
 0x2c6   : > { %v2443_v53 = vpop.permute.xlu1 %2442 }
 0x2c7   : > { %v2508_v35 = vsel %vm443_vm2, %v2506_v27, %v2443_v53  ;;  %v3053_v53 = vld [vmem:[%s4575_s1 + $0x20] sm:$0xf] }
 0x2c8   : > { %v2448_v63 = vpop.permute.xlu0 %2447 }
 0x2c9   : > { %v2510_v16 = vsel %vm446_vm3, %v2508_v35, %v2448_v63 }
 0x2ca   : > { %v2512_v49 = vsel %vm449_vm4, %v2510_v16, %v2453_v43 }
 0x2cd   : > { %v2468_v15 = vpop.permute.xlu2 %2467 }
 0x2ce   : > { %v2483_v56 = vpop.permute.xlu1 %2482 }
 0x2cf   : > { %v2525_v11 = vsel %vm446_vm3, %v2523_v26, %v2483_v56 }
 0x2d0   : > { %v2488_v45 = vpop.permute.xlu0 %2487 }
 0x2d1   : > { %v2527_v46 = vsel %vm449_vm4, %v2525_v11, %v2488_v45 }
 0x2d2   : > { %v2529_v7 = vsel %vm452_vm5, %v2527_v46, %v2493_v52 }
 0x2d5   : > { %v2754_v50 = vpop.permute.xlu2 %2753 }
 0x2d6   : > { %v2458_v38 = vpop.permute.xlu1 %2457  ;;  %v2802_v17 = vsel %vm439_vm1, %v4383_v6, %v2754_v50 }
 0x2d7   : > { %v2514_v48 = vsel %vm452_vm5, %v2512_v49, %v2458_v38  ;;  %v795_v54 = vpop.f32.mrf.mxu3 }
 0x2d8   : > { %v2463_v33 = vpop.permute.xlu0 %2462  ;;  %v782_v28 = vpop.f32.mrf.mxu2  ;;  %v796_v42 = vadd.f32 %v795_v54, %v762_v0 }
 0x2d9   : > { %v2516_v47 = vsel %vm455_vm6, %v2514_v48, %v2463_v33  ;;  %v783_v29 = vadd.f32 %v782_v28, %v749_v40 }
 0x2da   : > { %v2518_v30 = vsel %vm458_vm7, %v2516_v47, %v2468_v15 }
 0x2db   : > { %v2539_v61 = vsel %vm735_vm8, %v2518_v30, 0 }
 0x2dc   : > { %2550 = vmatpush.bf16.msrb.mxu2 %v2539_v61 }
 0x2dd   : > { %v2729_v5 = vpop.permute.xlu2 %2728 }
 0x2de   : > { %v2498_v41 = vpop.permute.xlu1 %2497 }
 0x2df   : > { %v2531_v24 = vsel %vm455_vm6, %v2529_v7, %v2498_v41  ;;  %3051 = vmatmul.msk.bf16.vlgmr.msrb.gmra.mxu2 %vm731_vm15, %v3050_v14  ;;  %v797_v43 = vpop.f32.mrf.mxu3 }
 0x2e0   : > { %v2503_v57 = vpop.permute.xlu0 %2502  ;;  %v784_v34 = vpop.f32.mrf.mxu2 }
 0x2e1   : > { %v2533_v51 = vsel %vm458_vm7, %v2531_v24, %v2503_v57 }
 0x2e2   : > { %v2541_v1 = vsel %vm735_vm8, %v2533_v51, 0 }
 0x2e3   : > { %2563 = vmatpush.bf16.msrb.mxu3 %v2541_v1 }
 0x2e5   : > { %v2769_v20 = vpop.permute.xlu2 %2768 }
 0x2e6   : > { %v2719_v44 = vpop.permute.xlu1 %2718  ;;  %3052 = vmatmul.msk.bf16.vlgmr.msrb.gmra.mxu3 %vm731_vm15, %v3050_v14 }
 0x2e7   : > { %v2787_v13 = vsel %vm439_vm1, %v4349_v4, %v2719_v44 }
 0x2e8   : > { %v2724_v31 = vpop.permute.xlu0 %2723 }
 0x2e9   : > { %v2789_v39 = vsel %vm443_vm2, %v2787_v13, %v2724_v31 }
 0x2ea   : > { %v2791_v6 = vsel %vm446_vm3, %v2789_v39, %v2729_v5 }
 0x2ed   : > { %v2744_v55 = vpop.permute.xlu2 %2743 }
 0x2ee   : > { %v2759_v10 = vpop.permute.xlu1 %2758 }
 0x2ef   : > { %v2804_v12 = vsel %vm443_vm2, %v2802_v17, %v2759_v10  ;;  %v1061_v35 = vpop.f32.mrf.mxu0  ;;  %v1074_v16 = vpop.f32.mrf.mxu1 }
 0x2f0   : > { %v2764_v58 = vpop.permute.xlu0 %2763  ;;  %v1078_v45 = vadd.f32 %v1061_v35, %v783_v29  ;;  %v1079_v8 = vadd.f32 %v1074_v16, %v796_v42 }
 0x2f1   : > { %v2806_v18 = vsel %vm446_vm3, %v2804_v12, %v2764_v58 }
 0x2f2   : > { %v2808_v25 = vsel %vm449_vm4, %v2806_v18, %v2769_v20 }
 0x2f5   : > { %v2784_v22 = vpop.permute.xlu2 %2783 }
 0x2f6   : > { %v2734_v3 = vpop.permute.xlu1 %2733 }
 0x2f7   : > { %v2793_v19 = vsel %vm449_vm4, %v2791_v6, %v2734_v3  ;;  %v1063_v38 = vpop.f32.mrf.mxu0  ;;  %v1076_v49 = vpop.f32.mrf.mxu1 }
 0x2f8   : > { %v2739_v9 = vpop.permute.xlu0 %2738 }
 0x2f9   : > { %v2795_v32 = vsel %vm452_vm5, %v2793_v19, %v2739_v9 }
 0x2fa   : > { %v2797_v56 = vsel %vm455_vm6, %v2795_v32, %v2744_v55 }
 0x2fe   : > { %v2774_v36 = vpop.permute.xlu1 %2773 }
 0x2ff   : > { %v2810_v60 = vsel %vm452_vm5, %v2808_v25, %v2774_v36 }
 0x300   : > { %v2779_v62 = vpop.permute.xlu0 %2778 }
 0x301   : > { %v2812_v4 = vsel %vm455_vm6, %v2810_v60, %v2779_v62 }
 0x302   : > { %v2814_v21 = vsel %vm458_vm7, %v2812_v4, %v2784_v22 }
 0x303   : > { %v2822_v52 = vsel %vm735_vm8, %v2814_v21, 0  ;;  %v1409_v26 = vpop.f32.mrf.mxu2  ;;  %v1422_v48 = vpop.f32.mrf.mxu3 }
 0x304   : > { %2844 = vmatpush.bf16.msra.mxu1 %v2822_v52  ;;  %v1426_v11 = vadd.f32 %v1409_v26, %v1078_v45  ;;  %v1427_v33 = vadd.f32 %v1422_v48, %v1079_v8 }
 0x306   : > { %v2749_v63 = vpop.permute.xlu1 %2748 }
 0x307   : > { %v2799_v27 = vsel %vm458_vm7, %v2797_v56, %v2749_v63  ;;  %3055 = vmatmul.msk.bf16.vlgmr.msra.gmra.mxu1 %vm731_vm15, %v3053_v53 }
 0x308   : > { %v2820_v15 = vsel %vm735_vm8, %v2799_v27, 0 }
 0x309   : > { %2831 = vmatpush.bf16.msra.mxu0 %v2820_v15 }
 0x30b   : > { %v1411_v50 = vpop.f32.mrf.mxu2  ;;  %v1424_v47 = vpop.f32.mrf.mxu3 }
 0x30c   : > { %3054 = vmatmul.msk.bf16.vlgmr.msra.gmra.mxu0 %vm731_vm15, %v3053_v53 }
 0x317   : > { %v1690_v30 = vpop.f32.mrf.mxu0  ;;  %v1703_v46 = vpop.f32.mrf.mxu1 }
 0x318   : > { %v1707_v61 = vadd.f32 %v1690_v30, %v1426_v11  ;;  %v1708_v14 = vadd.f32 %v1703_v46, %v1427_v33 }
 0x31a   : > { %v1984_v7 = vpop.f32.mrf.mxu3 }
 0x31b   : > { %v1989_v57 = vadd.f32 %v1984_v7, %v1708_v14 }
 0x31f   : > { %v1971_v41 = vpop.f32.mrf.mxu2  ;;  %v1692_v51 = vpop.f32.mrf.mxu0 }
 0x320   : > { %v1988_v24 = vadd.f32 %v1971_v41, %v1707_v61  ;;  %v1705_v1 = vpop.f32.mrf.mxu1 }
 0x322   : > { %v1986_v44 = vpop.f32.mrf.mxu3 }
 0x325   : > { %v2856_v55 = vpop.permute.xlu0 %2855 }
 0x327   : > { %v1973_v5 = vpop.f32.mrf.mxu2 }
 0x33b   : > { %v2271_v31 = vpop.f32.mrf.mxu0 }
 0x33c   : > { %v2288_v2 = vadd.f32 %v2271_v31, %v1988_v24 }
 0x341   : > { %v2284_v40 = vpop.f32.mrf.mxu1 }
 0x342   : > { %v2289_v0 = vadd.f32 %v2284_v40, %v1989_v57 }
 0x343   : > { %v2273_v20 = vpop.f32.mrf.mxu0 }
 0x349   : > { %v2286_v23 = vpop.f32.mrf.mxu1 }
 0x362   : > { %v2552_v10 = vpop.f32.mrf.mxu2 }
 0x363   : > { %v2569_v9 = vadd.f32 %v2552_v10, %v2288_v2 }
 0x369   : > { %v2565_v58 = vpop.f32.mrf.mxu3 }
 0x36a   : > { %v2554_v37 = vpop.f32.mrf.mxu2  ;;  %v2570_v3 = vadd.f32 %v2565_v58, %v2289_v0 }
 0x371   : > { %v2567_v59 = vpop.f32.mrf.mxu3 }
 0x384   : > { %v2846_v17 = vpop.f32.mrf.mxu1 }
 0x385   : > { %v2851_v54 = vadd.f32 %v2846_v17, %v2570_v3 }
 0x387   : > { %v2859_v12 = vadd.f32 %v2856_v55, %v2851_v54 }
 0x389   : > { %v3057_v28 = vmul.f32 -1.442695, %v2859_v12  ;;  %v2833_v42 = vpop.f32.mrf.mxu0 }
 0x38a   : > { %v2850_v13 = vadd.f32 %v2833_v42, %v2569_v9 }
 0x38b   : > { %3099 = vpow2.f32 %v3057_v28 }
 0x38c   : > { %v2858_v29 = vadd.f32 %v2856_v55, %v2850_v13  ;;  %v2848_v18 = vpop.f32.mrf.mxu1 }
 0x38e   : > { %v3056_v39 = vmul.f32 -1.442695, %v2858_v29 }
 0x390   : > { %3101 = vpow2.f32 %v3056_v39 }
 0x391   : > { %v3100_v36 = vpop.eup %3099  ;;  %v2835_v25 = vpop.f32.mrf.mxu0 }
 0x392   : > { %v2867_v6 = vadd.f32 1.0, %v3100_v36 }
 0x394   : > { %3103 = vrcp.f32 %v2867_v6  ;;  %v2894_v52 = vand.u32 2147483648, %v2867_v6  ;;  %vm2888_vm1 = vweird.f32 %v2867_v6  ;;  %v2892_v53 = vand.u32 2147483647, %v2867_v6 }
 0x396   : > { %v3102_v60 = vpop.eup %3101  ;;  %v2895_v45 = vor.u32 1.1754944e-38, %v2894_v52  ;;  %vm2893_vm4 = vcmp.eq.f32.partialorder %v2892_v53, 8.507059e+37 }
 0x397   : > { %v2866_v43 = vadd.f32 1.0, %v3102_v60 }
 0x399   : > { %3105 = vrcp.f32 %v2866_v43  ;;  %v2879_v56 = vand.u32 2147483648, %v2866_v43  ;;  %v2877_v35 = vand.u32 2147483647, %v2866_v43  ;;  %vm2873_vm5 = vweird.f32 %v2866_v43 }
 0x39a   : > { %v3104_v19 = vpop.eup %3103 }
 0x39b   : > { %v2884_v62 = vmul.f32 %v3104_v19, %v2867_v6  ;;  %vm2889_vm0 = vweird.f32 %v3104_v19  ;;  %v2880_v38 = vor.u32 1.1754944e-38, %v2879_v56  ;;  %vm2878_vm7 = vcmp.eq.f32.partialorder %v2877_v35, 8.507059e+37 }
 0x39c   : > { %vm2890_vm2 = vmor %vm2888_vm1, %vm2889_vm0 }
 0x39d   : > { %v2885_v34 = vsub.f32 1.0, %v2884_v62 }
 0x39f   : > { %v3106_v22 = vpop.eup %3105  ;;  %v2886_v4 = vmul.f32 %v3104_v19, %v2885_v34 }
 0x3a0   : > { %v2869_v21 = vmul.f32 %v3106_v22, %v2866_v43  ;;  %vm2874_vm3 = vweird.f32 %v3106_v22 }
 0x3a1   : > { %v2887_v32 = vadd.f32 %v3104_v19, %v2886_v4  ;;  %vm2875_vm6 = vmor %vm2873_vm5, %vm2874_vm3 }
 0x3a2   : > { %v2870_v63 = vsub.f32 1.0, %v2869_v21 }
 0x3a3   : > { %v2891_v27 = vsel %vm2890_vm2, %v3104_v19, %v2887_v32 }
 0x3a4   : > { %v2871_v15 = vmul.f32 %v3106_v22, %v2870_v63  ;;  %v2896_v8 = vsel %vm2893_vm4, %v2895_v45, %v2891_v27 }
 0x3a5   : > { %v2899_v48 = vmul.f32 %v2896_v8, %v2859_v12 }
 0x3a6   : > { %v2872_v16 = vadd.f32 %v3106_v22, %v2871_v15 }
 0x3a8   : > { %v2876_v49 = vsel %vm2875_vm6, %v3106_v22, %v2872_v16 }
 0x3a9   : > { %v2881_v26 = vsel %vm2878_vm7, %v2880_v38, %v2876_v49 }
 0x3aa   : > { %v2898_v11 = vmul.f32 %v2881_v26, %v2858_v29 }
 0x3ac   : > { %v2900_v33 = vpack.c.bf16 %v2899_v48, %v2898_v11 }
 0x3ae   : > { %2901 = vst [vmem:[%s226_s29] sm:$0xff] %v2900_v33 }
 0x3af PF: > { %s13_s14 = sadd.s32 1, %s3137_s14   ;;  %s4582_s12 = smov %s3133_s13 }
 0x3b0   : > { %p10_p5 = scmp.ge.s32.totalorder %s13_s14, 4   ;;  %s4583_s13 = smov %s4585_s15 }
 0x3b2   :  { %12 = sbr.rel (!%p10_p5) target bundleno = 2 (0x2), region = 76 }

</bundles_post_ra>
